<compile_context>
chip_gen: v6e
topology: v6e:2x2x1
jax: 0.10.0
libtpu: 0.0.40
codegen_flags: <defaults>
</compile_context>

<pallas_src>
import functools

import jax
import jax.numpy as jnp
from jax import lax
from jax.experimental import pallas as pl
from jax.experimental.pallas import tpu as pltpu


# ---------------------------------------------------------------------------
# Pallas kernel: action projection + rollout + reward decode + horizon sum
# ---------------------------------------------------------------------------
def _rollout_returns_kernel(act_ref,    # (T, Ap, tile) bf16  rows: [actions ; 1 ; 0]
                            h0_ref,     # (H, tile)     bf16
                            s0_ref,     # (S, tile)     bf16
                            WahT_ref,   # (H, Ap)       bf16  cols: [Wah.T | bh | 0]
                            Wtr_ref,    # (H, H+S)      bf16  = [Whh.T | Wsh.T]
                            Whs_ref,    # (S, H)        bf16  = Whs.T
                            bs_ref,     # (S, 1)        f32
                            wr_ref,     # (1, H+S)      bf16  = [wrh.T | wrs.T]
                            ret_ref):   # (1, tile)     f32
    """For one tile of candidate columns (candidates on lanes):
         h_t = tanh(WahT @ act_aug_t + Wtr @ [h_{t-1}; s_{t-1}])   (bh folded in)
         s_t = tanh(Whs @ h_t + bs)
       ret  = sum_t ( wr @ [h_t; s_t] )                      shape: (1, tile)
       (the reference's + T*br constant is added by the wrapper)
    """
    T = act_ref.shape[0]
    S = s0_ref.shape[0]
    tile = h0_ref.shape[1]
    sdt = h0_ref.dtype                       # bf16 recurrent-state dtype

    # Weights loaded once; only the small bs bias is broadcast (hoisted).
    WahT = WahT_ref[...]
    Wtr = Wtr_ref[...]
    Whs = Whs_ref[...]
    wr = wr_ref[...]
    bs_b = jnp.broadcast_to(bs_ref[...], (S, tile))            # f32

    # [h; s] concat is at a 16-row (bf16 sublane-group) aligned boundary.
    hs = jnp.concatenate([h0_ref[...], s0_ref[...]], axis=0)   # (H+S, tile) bf16
    ret = jnp.zeros((1, tile), jnp.float32)

    # plan_horizon is small & static -> unrolled loop keeps the MXU fed.
    for t in range(T):
        pre_h = (jnp.dot(WahT, act_ref[t], preferred_element_type=jnp.float32)
                 + jnp.dot(Wtr, hs, preferred_element_type=jnp.float32))
        h = jnp.tanh(pre_h).astype(sdt)                        # tanh in f32 (EUP)
        pre_s = jnp.dot(Whs, h, preferred_element_type=jnp.float32) + bs_b
        s = jnp.tanh(pre_s).astype(sdt)
        hs = jnp.concatenate([h, s], axis=0)
        # Reward head folded into the loop (no h_sum/s_sum accumulators).
        ret = ret + jnp.dot(wr, hs, preferred_element_type=jnp.float32)

    ret_ref[...] = ret                                         # lane-dense store


def _returns_pallas(act, h0, s0, WahT, Wtr, Whs, bs_col, wr_row, *, tile):
    """act: (T, Ap, Np) bf16; h0: (H, Np); s0: (S, Np); Np % tile == 0.
       Returns f32 (Np,) per-candidate summed rewards (without the T*br term)."""
    T, Ap, Np = act.shape
    H = h0.shape[0]
    S = s0.shape[0]
    assert Np % tile == 0
    G = Np // tile

    def full_spec(arr):
        nd = arr.ndim
        return pl.BlockSpec(arr.shape, lambda i, _n=nd: (0,) * _n)

    out = pl.pallas_call(
        _rollout_returns_kernel,
        out_shape=jax.ShapeDtypeStruct((1, Np), jnp.float32),
        grid_spec=pltpu.PrefetchScalarGridSpec(
            num_scalar_prefetch=0,
            grid=(G,),
            in_specs=[
                pl.BlockSpec((T, Ap, tile), lambda i: (0, 0, i)),   # actions
                pl.BlockSpec((H, tile), lambda i: (0, i)),          # h0
                pl.BlockSpec((S, tile), lambda i: (0, i)),          # s0
                full_spec(WahT),                                    # (H, Ap)
                full_spec(Wtr),                                     # (H, H+S)
                full_spec(Whs),                                     # (S, H)
                full_spec(bs_col),                                  # (S, 1)
                full_spec(wr_row),                                  # (1, H+S)
            ],
            out_specs=pl.BlockSpec((1, tile), lambda i: (0, i)),
        ),
        compiler_params=pltpu.CompilerParams(
            dimension_semantics=("parallel",)),
    )(act, h0, s0, WahT, Wtr, Whs, bs_col, wr_row)
    return out[0]


def _pick_tile(n, max_tile):
    """Largest tile <= max_tile (multiple of 128) s.t. the grid has >= 2 steps
    when possible (keeps both v7x TensorCores busy); floor at 128."""
    tile = max(128, max_tile)
    while tile > 128 and pl.cdiv(n, tile) < 2:
        tile //= 2
    return tile


# ---------------------------------------------------------------------------
# CEM planner (mirrors Planner.forward / Planner._fit_gaussian)
# ---------------------------------------------------------------------------
def _plan_impl(hidden, state, key, prep, *, action_size, plan_horizon,
               optim_iters, candidates, top_candidates, max_tile):
    B, H = hidden.shape
    S = state.shape[1]
    T, C, A = plan_horizon, candidates, action_size
    N = B * C
    Ap = prep['WahT'].shape[1]

    tile = _pick_tile(N, max_tile)
    Np = pl.cdiv(N, tile) * tile

    # Initial hidden/state expanded over candidates, candidate axis last
    # (lanes), built ONCE, bf16, pre-padded to the tiled lane extent.
    def expand(x):                                     # (B, D) -> (D, Np) bf16
        D = x.shape[1]
        xt = jnp.broadcast_to(x.T[:, :, None], (D, B, C)).reshape(D, N)
        return jnp.pad(xt, ((0, 0), (0, Np - N))).astype(jnp.bfloat16)

    h0 = expand(hidden)
    s0 = expand(state)

    # Feature-major Gaussian parameters: (T, A, B, 1) -- same distribution as
    # the reference's (T, B, 1, A), just a different axis order.
    action_mean = jnp.zeros((T, A, B, 1), jnp.float32)
    action_std = jnp.ones((T, A, B, 1), jnp.float32)

    # Constant augmentation rows: a 1-row (folds bh into WahT) + zero pad rows.
    aug_rows = jnp.concatenate(
        [jnp.ones((T, 1, N), jnp.float32),
         jnp.zeros((T, Ap - A - 1, N), jnp.float32)], axis=1)

    for _ in range(optim_iters):
        key, sub = jax.random.split(key)
        eps = jax.random.normal(sub, (T, A, B, C), jnp.float32)
        actions = (action_mean + action_std * eps).reshape(T, A, N)   # f32

        # Kernel input: augment rows, cast bf16, pad lane axis (cheap fusion).
        act_aug = jnp.concatenate([actions, aug_rows], axis=1)
        act_aug = jnp.pad(act_aug.astype(jnp.bfloat16),
                          ((0, 0), (0, 0), (0, Np - N)))

        # Hot path: projection + rollout + reward + horizon sum, in Pallas.
        returns = _returns_pallas(act_aug, h0, s0,
                                  prep['WahT'], prep['Wtr'], prep['Whs'],
                                  prep['bs_col'], prep['wr_row'], tile=tile)
        returns = returns[:N].reshape(B, C) + T * prep['br']

        # CEM refit (matches Planner._fit_gaussian; ddof=0 == unbiased=False).
        _, topk = lax.top_k(returns, top_candidates)                  # (B, K)
        topk = (topk + C * jnp.arange(B, dtype=topk.dtype)[:, None]).reshape(-1)
        best = actions[:, :, topk].reshape(T, A, B, top_candidates)
        action_mean = best.mean(axis=3, keepdims=True)
        action_std = best.std(axis=3, keepdims=True)

    # reference: action_mean[0].squeeze(dim=1) -> (B, A)
    return action_mean[0, :, :, 0].T


class PallasPlanner:
    def __init__(self, params, action_size, plan_horizon=12, optim_iters=10,
                 candidates=1000, top_candidates=100, max_tile=256):
        Wah, Whh, Wsh, bh, Whs, bs, wrh, wrs, br = params
        H = Whh.shape[0]
        A = Wah.shape[0]
        Ap = max(8, ((A + 1 + 7) // 8) * 8)            # room for the bias row
        WahT = jnp.zeros((H, Ap), jnp.float32)
        WahT = WahT.at[:, :A].set(Wah.T).at[:, A].set(bh[0])
        # Restructure weights once for the candidates-on-lanes kernel layout;
        # MXU operands stored in bf16 (accumulation stays f32 in-kernel).
        self.prep = dict(
            WahT=WahT.astype(jnp.bfloat16),                              # (H, Ap)
            Wtr=jnp.concatenate([Whh.T, Wsh.T], axis=1).astype(jnp.bfloat16),
            Whs=Whs.T.astype(jnp.bfloat16),                              # (S, H)
            bs_col=bs.T,                                                 # (S, 1) f32
            wr_row=jnp.concatenate([wrh.T, wrs.T], axis=1).astype(jnp.bfloat16),
            br=br[0, 0],                                                 # scalar f32
        )
        self._plan = jax.jit(functools.partial(
            _plan_impl,
            action_size=action_size, plan_horizon=plan_horizon,
            optim_iters=optim_iters, candidates=candidates,
            top_candidates=top_candidates, max_tile=max_tile))

    def __call__(self, hidden, state, key):
        return self._plan(hidden, state, key, self.prep)


# ---------------------------------------------------------------------------
# Deterministic synthetic "model" parameters
# ---------------------------------------------------------------------------
def make_params(key, hidden_size, state_size, action_size):
    ks = jax.random.split(key, 9)
    sc = lambda fan_in: 1.0 / jnp.sqrt(jnp.float32(fan_in))
    Wah = jax.random.normal(ks[0], (action_size, hidden_size), jnp.float32) * sc(action_size)
    Whh = jax.random.normal(ks[1], (hidden_size, hidden_size), jnp.float32) * sc(hidden_size)
    Wsh = jax.random.normal(ks[2], (state_size, hidden_size), jnp.float32) * sc(state_size)
    bh = jax.random.normal(ks[3], (1, hidden_size), jnp.float32) * 0.1
    Whs = jax.random.normal(ks[4], (hidden_size, state_size), jnp.float32) * sc(hidden_size)
    bs = jax.random.normal(ks[5], (1, state_size), jnp.float32) * 0.1
    wrh = jax.random.normal(ks[6], (hidden_size, 1), jnp.float32) * sc(hidden_size)
    wrs = jax.random.normal(ks[7], (state_size, 1), jnp.float32) * sc(state_size)
    br = jax.random.normal(ks[8], (1, 1), jnp.float32) * 0.1
    return (Wah, Whh, Wsh, bh, Whs, bs, wrh, wrs, br)


if __name__ == "__main__":
    # Small shapes consistent with Planner.forward.  candidates=100 gives
    # N=200: the auto-tile picker drops to tile=128 -> a 2-step grid (both
    # v7x TensorCores busy) and exercises the zero-padded lane tail.
    batch_size = 2
    hidden_size = 32
    state_size = 32
    action_size = 4
    plan_horizon = 8
    optim_iters = 3
    candidates = 100
    top_candidates = 16

    root = jax.random.PRNGKey(0)
    k_param, k_hidden, k_state, k_plan = jax.random.split(root, 4)

    params = make_params(k_param, hidden_size, state_size, action_size)
    hidden = jax.random.normal(k_hidden, (batch_size, hidden_size), jnp.float32)
    state = jax.random.normal(k_state, (batch_size, state_size), jnp.float32)

    planner = PallasPlanner(
        params, action_size,
        plan_horizon=plan_horizon, optim_iters=optim_iters,
        candidates=candidates, top_candidates=top_candidates, max_tile=256)

    out = planner(hidden, state, k_plan)          # (batch_size, action_size)
    out = jax.block_until_ready(out)
    assert out.shape == (batch_size, action_size)
    assert jnp.all(jnp.isfinite(out))
    print("KERNEL_OK")
</pallas_src>

<mosaic_0001>
module attributes {stable_mosaic.version = 11 : i64} {
  func.func @_rollout_returns_kernel(%arg0: i32, %arg1: memref<8x8x128xbf16, #tpu.memory_space<vmem>>, %arg2: memref<32x128xbf16, #tpu.memory_space<vmem>>, %arg3: memref<32x128xbf16, #tpu.memory_space<vmem>>, %arg4: memref<32x8xbf16, #tpu.memory_space<vmem>>, %arg5: memref<32x64xbf16, #tpu.memory_space<vmem>>, %arg6: memref<32x32xbf16, #tpu.memory_space<vmem>>, %arg7: memref<32x1xf32, #tpu.memory_space<vmem>>, %arg8: memref<1x64xbf16, #tpu.memory_space<vmem>>, %arg9: memref<1x128xf32, #tpu.memory_space<vmem>>) attributes {dimension_semantics = [#tpu.dimension_semantics<parallel>], iteration_bounds = array<i64: 2>, scalar_prefetch = 0 : i64, scratch_operands = 0 : i64, tpu.core_type = #tpu.core_type<tc>, window_params = [{transform_indices = @transform_0, window_bounds = array<i64: 8, 8, 128>}, {transform_indices = @transform_1, window_bounds = array<i64: 32, 128>}, {transform_indices = @transform_2, window_bounds = array<i64: 32, 128>}, {pipeline_mode = #tpu.pipeline_mode<synchronous>, transform_indices = @transform_3, window_bounds = array<i64: 32, 8>}, {pipeline_mode = #tpu.pipeline_mode<synchronous>, transform_indices = @transform_4, window_bounds = array<i64: 32, 64>}, {pipeline_mode = #tpu.pipeline_mode<synchronous>, transform_indices = @transform_5, window_bounds = array<i64: 32, 32>}, {pipeline_mode = #tpu.pipeline_mode<synchronous>, transform_indices = @transform_6, window_bounds = array<i64: 32, 1>}, {pipeline_mode = #tpu.pipeline_mode<synchronous>, transform_indices = @transform_7, window_bounds = array<i64: 1, 64>}, {transform_indices = @transform_8, window_bounds = array<i64: 1, 128>}]} {
    %c0 = arith.constant 0 : index
    %c0_0 = arith.constant 0 : index
    %0 = vector.load %arg4[%c0, %c0_0] : memref<32x8xbf16, #tpu.memory_space<vmem>>, vector<32x8xbf16>
    %c0_1 = arith.constant 0 : index
    %c0_2 = arith.constant 0 : index
    %1 = vector.load %arg5[%c0_1, %c0_2] : memref<32x64xbf16, #tpu.memory_space<vmem>>, vector<32x64xbf16>
    %c0_3 = arith.constant 0 : index
    %c0_4 = arith.constant 0 : index
    %2 = vector.load %arg6[%c0_3, %c0_4] : memref<32x32xbf16, #tpu.memory_space<vmem>>, vector<32x32xbf16>
    %c0_5 = arith.constant 0 : index
    %c0_6 = arith.constant 0 : index
    %3 = vector.load %arg8[%c0_5, %c0_6] : memref<1x64xbf16, #tpu.memory_space<vmem>>, vector<1x64xbf16>
    %c0_7 = arith.constant 0 : index
    %c0_8 = arith.constant 0 : index
    %4 = vector.load %arg7[%c0_7, %c0_8] : memref<32x1xf32, #tpu.memory_space<vmem>>, vector<32x1xf32>
    %5 = vector.shape_cast %4 : vector<32x1xf32> to vector<32x1xf32>
    %6 = vector.broadcast %5 : vector<32x1xf32> to vector<32x128xf32>
    %c0_9 = arith.constant 0 : index
    %c0_10 = arith.constant 0 : index
    %7 = vector.load %arg2[%c0_9, %c0_10] : memref<32x128xbf16, #tpu.memory_space<vmem>>, vector<32x128xbf16>
    %c0_11 = arith.constant 0 : index
    %c0_12 = arith.constant 0 : index
    %8 = vector.load %arg3[%c0_11, %c0_12] : memref<32x128xbf16, #tpu.memory_space<vmem>>, vector<32x128xbf16>
    %9 = tpu.concatenate %7, %8 in 0 : vector<32x128xbf16>, vector<32x128xbf16> -> vector<64x128xbf16>
    %cst = arith.constant 0.000000e+00 : f32
    %10 = vector.broadcast %cst : f32 to vector<1x128xf32>
    %c0_13 = arith.constant 0 : index
    %c0_14 = arith.constant 0 : index
    %c0_15 = arith.constant 0 : index
    %11 = vector.load %arg1[%c0_13, %c0_14, %c0_15] : memref<8x8x128xbf16, #tpu.memory_space<vmem>>, vector<1x8x128xbf16>
    %12 = vector.shape_cast %11 : vector<1x8x128xbf16> to vector<8x128xbf16>
    %cst_16 = arith.constant dense<0.000000e+00> : vector<32x128xf32>
    %13 = tpu.matmul %0, %12, %cst_16 {dimension_numbers = #tpu.dot_dimension_numbers<[1], [0], [0], [1], [0, 0, 1, 1], [], []>} : vector<32x8xbf16>, vector<8x128xbf16>, vector<32x128xf32> -> vector<32x128xf32>
    %cst_17 = arith.constant dense<0.000000e+00> : vector<32x128xf32>
    %14 = tpu.matmul %1, %9, %cst_17 {dimension_numbers = #tpu.dot_dimension_numbers<[1], [0], [0], [1], [0, 0, 1, 1], [], []>} : vector<32x64xbf16>, vector<64x128xbf16>, vector<32x128xf32> -> vector<32x128xf32>
    %15 = arith.addf %13, %14 : vector<32x128xf32>
    %16 = math.tanh %15 : vector<32x128xf32>
    %17 = arith.truncf %16 : vector<32x128xf32> to vector<32x128xbf16>
    %cst_18 = arith.constant dense<0.000000e+00> : vector<32x128xf32>
    %18 = tpu.matmul %2, %17, %cst_18 {dimension_numbers = #tpu.dot_dimension_numbers<[1], [0], [0], [1], [0, 0, 1, 1], [], []>} : vector<32x32xbf16>, vector<32x128xbf16>, vector<32x128xf32> -> vector<32x128xf32>
    %19 = arith.addf %18, %6 : vector<32x128xf32>
    %20 = math.tanh %19 : vector<32x128xf32>
    %21 = arith.truncf %20 : vector<32x128xf32> to vector<32x128xbf16>
    %22 = tpu.concatenate %17, %21 in 0 : vector<32x128xbf16>, vector<32x128xbf16> -> vector<64x128xbf16>
    %cst_19 = arith.constant dense<0.000000e+00> : vector<1x128xf32>
    %23 = tpu.matmul %3, %22, %cst_19 {dimension_numbers = #tpu.dot_dimension_numbers<[1], [0], [0], [1], [0, 0, 1, 1], [], []>} : vector<1x64xbf16>, vector<64x128xbf16>, vector<1x128xf32> -> vector<1x128xf32>
    %24 = arith.addf %10, %23 : vector<1x128xf32>
    %c1 = arith.constant 1 : index
    %c0_20 = arith.constant 0 : index
    %c0_21 = arith.constant 0 : index
    %25 = vector.load %arg1[%c1, %c0_20, %c0_21] : memref<8x8x128xbf16, #tpu.memory_space<vmem>>, vector<1x8x128xbf16>
    %26 = vector.shape_cast %25 : vector<1x8x128xbf16> to vector<8x128xbf16>
    %cst_22 = arith.constant dense<0.000000e+00> : vector<32x128xf32>
    %27 = tpu.matmul %0, %26, %cst_22 {dimension_numbers = #tpu.dot_dimension_numbers<[1], [0], [0], [1], [0, 0, 1, 1], [], []>} : vector<32x8xbf16>, vector<8x128xbf16>, vector<32x128xf32> -> vector<32x128xf32>
    %cst_23 = arith.constant dense<0.000000e+00> : vector<32x128xf32>
    %28 = tpu.matmul %1, %22, %cst_23 {dimension_numbers = #tpu.dot_dimension_numbers<[1], [0], [0], [1], [0, 0, 1, 1], [], []>} : vector<32x64xbf16>, vector<64x128xbf16>, vector<32x128xf32> -> vector<32x128xf32>
    %29 = arith.addf %27, %28 : vector<32x128xf32>
    %30 = math.tanh %29 : vector<32x128xf32>
    %31 = arith.truncf %30 : vector<32x128xf32> to vector<32x128xbf16>
    %cst_24 = arith.constant dense<0.000000e+00> : vector<32x128xf32>
    %32 = tpu.matmul %2, %31, %cst_24 {dimension_numbers = #tpu.dot_dimension_numbers<[1], [0], [0], [1], [0, 0, 1, 1], [], []>} : vector<32x32xbf16>, vector<32x128xbf16>, vector<32x128xf32> -> vector<32x128xf32>
    %33 = arith.addf %32, %6 : vector<32x128xf32>
    %34 = math.tanh %33 : vector<32x128xf32>
    %35 = arith.truncf %34 : vector<32x128xf32> to vector<32x128xbf16>
    %36 = tpu.concatenate %31, %35 in 0 : vector<32x128xbf16>, vector<32x128xbf16> -> vector<64x128xbf16>
    %cst_25 = arith.constant dense<0.000000e+00> : vector<1x128xf32>
    %37 = tpu.matmul %3, %36, %cst_25 {dimension_numbers = #tpu.dot_dimension_numbers<[1], [0], [0], [1], [0, 0, 1, 1], [], []>} : vector<1x64xbf16>, vector<64x128xbf16>, vector<1x128xf32> -> vector<1x128xf32>
    %38 = arith.addf %24, %37 : vector<1x128xf32>
    %c2 = arith.constant 2 : index
    %c0_26 = arith.constant 0 : index
    %c0_27 = arith.constant 0 : index
    %39 = vector.load %arg1[%c2, %c0_26, %c0_27] : memref<8x8x128xbf16, #tpu.memory_space<vmem>>, vector<1x8x128xbf16>
    %40 = vector.shape_cast %39 : vector<1x8x128xbf16> to vector<8x128xbf16>
    %cst_28 = arith.constant dense<0.000000e+00> : vector<32x128xf32>
    %41 = tpu.matmul %0, %40, %cst_28 {dimension_numbers = #tpu.dot_dimension_numbers<[1], [0], [0], [1], [0, 0, 1, 1], [], []>} : vector<32x8xbf16>, vector<8x128xbf16>, vector<32x128xf32> -> vector<32x128xf32>
    %cst_29 = arith.constant dense<0.000000e+00> : vector<32x128xf32>
    %42 = tpu.matmul %1, %36, %cst_29 {dimension_numbers = #tpu.dot_dimension_numbers<[1], [0], [0], [1], [0, 0, 1, 1], [], []>} : vector<32x64xbf16>, vector<64x128xbf16>, vector<32x128xf32> -> vector<32x128xf32>
    %43 = arith.addf %41, %42 : vector<32x128xf32>
    %44 = math.tanh %43 : vector<32x128xf32>
    %45 = arith.truncf %44 : vector<32x128xf32> to vector<32x128xbf16>
    %cst_30 = arith.constant dense<0.000000e+00> : vector<32x128xf32>
    %46 = tpu.matmul %2, %45, %cst_30 {dimension_numbers = #tpu.dot_dimension_numbers<[1], [0], [0], [1], [0, 0, 1, 1], [], []>} : vector<32x32xbf16>, vector<32x128xbf16>, vector<32x128xf32> -> vector<32x128xf32>
    %47 = arith.addf %46, %6 : vector<32x128xf32>
    %48 = math.tanh %47 : vector<32x128xf32>
    %49 = arith.truncf %48 : vector<32x128xf32> to vector<32x128xbf16>
    %50 = tpu.concatenate %45, %49 in 0 : vector<32x128xbf16>, vector<32x128xbf16> -> vector<64x128xbf16>
    %cst_31 = arith.constant dense<0.000000e+00> : vector<1x128xf32>
    %51 = tpu.matmul %3, %50, %cst_31 {dimension_numbers = #tpu.dot_dimension_numbers<[1], [0], [0], [1], [0, 0, 1, 1], [], []>} : vector<1x64xbf16>, vector<64x128xbf16>, vector<1x128xf32> -> vector<1x128xf32>
    %52 = arith.addf %38, %51 : vector<1x128xf32>
    %c3 = arith.constant 3 : index
    %c0_32 = arith.constant 0 : index
    %c0_33 = arith.constant 0 : index
    %53 = vector.load %arg1[%c3, %c0_32, %c0_33] : memref<8x8x128xbf16, #tpu.memory_space<vmem>>, vector<1x8x128xbf16>
    %54 = vector.shape_cast %53 : vector<1x8x128xbf16> to vector<8x128xbf16>
    %cst_34 = arith.constant dense<0.000000e+00> : vector<32x128xf32>
    %55 = tpu.matmul %0, %54, %cst_34 {dimension_numbers = #tpu.dot_dimension_numbers<[1], [0], [0], [1], [0, 0, 1, 1], [], []>} : vector<32x8xbf16>, vector<8x128xbf16>, vector<32x128xf32> -> vector<32x128xf32>
    %cst_35 = arith.constant dense<0.000000e+00> : vector<32x128xf32>
    %56 = tpu.matmul %1, %50, %cst_35 {dimension_numbers = #tpu.dot_dimension_numbers<[1], [0], [0], [1], [0, 0, 1, 1], [], []>} : vector<32x64xbf16>, vector<64x128xbf16>, vector<32x128xf32> -> vector<32x128xf32>
    %57 = arith.addf %55, %56 : vector<32x128xf32>
    %58 = math.tanh %57 : vector<32x128xf32>
    %59 = arith.truncf %58 : vector<32x128xf32> to vector<32x128xbf16>
    %cst_36 = arith.constant dense<0.000000e+00> : vector<32x128xf32>
    %60 = tpu.matmul %2, %59, %cst_36 {dimension_numbers = #tpu.dot_dimension_numbers<[1], [0], [0], [1], [0, 0, 1, 1], [], []>} : vector<32x32xbf16>, vector<32x128xbf16>, vector<32x128xf32> -> vector<32x128xf32>
    %61 = arith.addf %60, %6 : vector<32x128xf32>
    %62 = math.tanh %61 : vector<32x128xf32>
    %63 = arith.truncf %62 : vector<32x128xf32> to vector<32x128xbf16>
    %64 = tpu.concatenate %59, %63 in 0 : vector<32x128xbf16>, vector<32x128xbf16> -> vector<64x128xbf16>
    %cst_37 = arith.constant dense<0.000000e+00> : vector<1x128xf32>
    %65 = tpu.matmul %3, %64, %cst_37 {dimension_numbers = #tpu.dot_dimension_numbers<[1], [0], [0], [1], [0, 0, 1, 1], [], []>} : vector<1x64xbf16>, vector<64x128xbf16>, vector<1x128xf32> -> vector<1x128xf32>
    %66 = arith.addf %52, %65 : vector<1x128xf32>
    %c4 = arith.constant 4 : index
    %c0_38 = arith.constant 0 : index
    %c0_39 = arith.constant 0 : index
    %67 = vector.load %arg1[%c4, %c0_38, %c0_39] : memref<8x8x128xbf16, #tpu.memory_space<vmem>>, vector<1x8x128xbf16>
    %68 = vector.shape_cast %67 : vector<1x8x128xbf16> to vector<8x128xbf16>
    %cst_40 = arith.constant dense<0.000000e+00> : vector<32x128xf32>
    %69 = tpu.matmul %0, %68, %cst_40 {dimension_numbers = #tpu.dot_dimension_numbers<[1], [0], [0], [1], [0, 0, 1, 1], [], []>} : vector<32x8xbf16>, vector<8x128xbf16>, vector<32x128xf32> -> vector<32x128xf32>
    %cst_41 = arith.constant dense<0.000000e+00> : vector<32x128xf32>
    %70 = tpu.matmul %1, %64, %cst_41 {dimension_numbers = #tpu.dot_dimension_numbers<[1], [0], [0], [1], [0, 0, 1, 1], [], []>} : vector<32x64xbf16>, vector<64x128xbf16>, vector<32x128xf32> -> vector<32x128xf32>
    %71 = arith.addf %69, %70 : vector<32x128xf32>
    %72 = math.tanh %71 : vector<32x128xf32>
    %73 = arith.truncf %72 : vector<32x128xf32> to vector<32x128xbf16>
    %cst_42 = arith.constant dense<0.000000e+00> : vector<32x128xf32>
    %74 = tpu.matmul %2, %73, %cst_42 {dimension_numbers = #tpu.dot_dimension_numbers<[1], [0], [0], [1], [0, 0, 1, 1], [], []>} : vector<32x32xbf16>, vector<32x128xbf16>, vector<32x128xf32> -> vector<32x128xf32>
    %75 = arith.addf %74, %6 : vector<32x128xf32>
    %76 = math.tanh %75 : vector<32x128xf32>
    %77 = arith.truncf %76 : vector<32x128xf32> to vector<32x128xbf16>
    %78 = tpu.concatenate %73, %77 in 0 : vector<32x128xbf16>, vector<32x128xbf16> -> vector<64x128xbf16>
    %cst_43 = arith.constant dense<0.000000e+00> : vector<1x128xf32>
    %79 = tpu.matmul %3, %78, %cst_43 {dimension_numbers = #tpu.dot_dimension_numbers<[1], [0], [0], [1], [0, 0, 1, 1], [], []>} : vector<1x64xbf16>, vector<64x128xbf16>, vector<1x128xf32> -> vector<1x128xf32>
    %80 = arith.addf %66, %79 : vector<1x128xf32>
    %c5 = arith.constant 5 : index
    %c0_44 = arith.constant 0 : index
    %c0_45 = arith.constant 0 : index
    %81 = vector.load %arg1[%c5, %c0_44, %c0_45] : memref<8x8x128xbf16, #tpu.memory_space<vmem>>, vector<1x8x128xbf16>
    %82 = vector.shape_cast %81 : vector<1x8x128xbf16> to vector<8x128xbf16>
    %cst_46 = arith.constant dense<0.000000e+00> : vector<32x128xf32>
    %83 = tpu.matmul %0, %82, %cst_46 {dimension_numbers = #tpu.dot_dimension_numbers<[1], [0], [0], [1], [0, 0, 1, 1], [], []>} : vector<32x8xbf16>, vector<8x128xbf16>, vector<32x128xf32> -> vector<32x128xf32>
    %cst_47 = arith.constant dense<0.000000e+00> : vector<32x128xf32>
    %84 = tpu.matmul %1, %78, %cst_47 {dimension_numbers = #tpu.dot_dimension_numbers<[1], [0], [0], [1], [0, 0, 1, 1], [], []>} : vector<32x64xbf16>, vector<64x128xbf16>, vector<32x128xf32> -> vector<32x128xf32>
    %85 = arith.addf %83, %84 : vector<32x128xf32>
    %86 = math.tanh %85 : vector<32x128xf32>
    %87 = arith.truncf %86 : vector<32x128xf32> to vector<32x128xbf16>
    %cst_48 = arith.constant dense<0.000000e+00> : vector<32x128xf32>
    %88 = tpu.matmul %2, %87, %cst_48 {dimension_numbers = #tpu.dot_dimension_numbers<[1], [0], [0], [1], [0, 0, 1, 1], [], []>} : vector<32x32xbf16>, vector<32x128xbf16>, vector<32x128xf32> -> vector<32x128xf32>
    %89 = arith.addf %88, %6 : vector<32x128xf32>
    %90 = math.tanh %89 : vector<32x128xf32>
    %91 = arith.truncf %90 : vector<32x128xf32> to vector<32x128xbf16>
    %92 = tpu.concatenate %87, %91 in 0 : vector<32x128xbf16>, vector<32x128xbf16> -> vector<64x128xbf16>
    %cst_49 = arith.constant dense<0.000000e+00> : vector<1x128xf32>
    %93 = tpu.matmul %3, %92, %cst_49 {dimension_numbers = #tpu.dot_dimension_numbers<[1], [0], [0], [1], [0, 0, 1, 1], [], []>} : vector<1x64xbf16>, vector<64x128xbf16>, vector<1x128xf32> -> vector<1x128xf32>
    %94 = arith.addf %80, %93 : vector<1x128xf32>
    %c6 = arith.constant 6 : index
    %c0_50 = arith.constant 0 : index
    %c0_51 = arith.constant 0 : index
    %95 = vector.load %arg1[%c6, %c0_50, %c0_51] : memref<8x8x128xbf16, #tpu.memory_space<vmem>>, vector<1x8x128xbf16>
    %96 = vector.shape_cast %95 : vector<1x8x128xbf16> to vector<8x128xbf16>
    %cst_52 = arith.constant dense<0.000000e+00> : vector<32x128xf32>
    %97 = tpu.matmul %0, %96, %cst_52 {dimension_numbers = #tpu.dot_dimension_numbers<[1], [0], [0], [1], [0, 0, 1, 1], [], []>} : vector<32x8xbf16>, vector<8x128xbf16>, vector<32x128xf32> -> vector<32x128xf32>
    %cst_53 = arith.constant dense<0.000000e+00> : vector<32x128xf32>
    %98 = tpu.matmul %1, %92, %cst_53 {dimension_numbers = #tpu.dot_dimension_numbers<[1], [0], [0], [1], [0, 0, 1, 1], [], []>} : vector<32x64xbf16>, vector<64x128xbf16>, vector<32x128xf32> -> vector<32x128xf32>
    %99 = arith.addf %97, %98 : vector<32x128xf32>
    %100 = math.tanh %99 : vector<32x128xf32>
    %101 = arith.truncf %100 : vector<32x128xf32> to vector<32x128xbf16>
    %cst_54 = arith.constant dense<0.000000e+00> : vector<32x128xf32>
    %102 = tpu.matmul %2, %101, %cst_54 {dimension_numbers = #tpu.dot_dimension_numbers<[1], [0], [0], [1], [0, 0, 1, 1], [], []>} : vector<32x32xbf16>, vector<32x128xbf16>, vector<32x128xf32> -> vector<32x128xf32>
    %103 = arith.addf %102, %6 : vector<32x128xf32>
    %104 = math.tanh %103 : vector<32x128xf32>
    %105 = arith.truncf %104 : vector<32x128xf32> to vector<32x128xbf16>
    %106 = tpu.concatenate %101, %105 in 0 : vector<32x128xbf16>, vector<32x128xbf16> -> vector<64x128xbf16>
    %cst_55 = arith.constant dense<0.000000e+00> : vector<1x128xf32>
    %107 = tpu.matmul %3, %106, %cst_55 {dimension_numbers = #tpu.dot_dimension_numbers<[1], [0], [0], [1], [0, 0, 1, 1], [], []>} : vector<1x64xbf16>, vector<64x128xbf16>, vector<1x128xf32> -> vector<1x128xf32>
    %108 = arith.addf %94, %107 : vector<1x128xf32>
    %c7 = arith.constant 7 : index
    %c0_56 = arith.constant 0 : index
    %c0_57 = arith.constant 0 : index
    %109 = vector.load %arg1[%c7, %c0_56, %c0_57] : memref<8x8x128xbf16, #tpu.memory_space<vmem>>, vector<1x8x128xbf16>
    %110 = vector.shape_cast %109 : vector<1x8x128xbf16> to vector<8x128xbf16>
    %cst_58 = arith.constant dense<0.000000e+00> : vector<32x128xf32>
    %111 = tpu.matmul %0, %110, %cst_58 {dimension_numbers = #tpu.dot_dimension_numbers<[1], [0], [0], [1], [0, 0, 1, 1], [], []>} : vector<32x8xbf16>, vector<8x128xbf16>, vector<32x128xf32> -> vector<32x128xf32>
    %cst_59 = arith.constant dense<0.000000e+00> : vector<32x128xf32>
    %112 = tpu.matmul %1, %106, %cst_59 {dimension_numbers = #tpu.dot_dimension_numbers<[1], [0], [0], [1], [0, 0, 1, 1], [], []>} : vector<32x64xbf16>, vector<64x128xbf16>, vector<32x128xf32> -> vector<32x128xf32>
    %113 = arith.addf %111, %112 : vector<32x128xf32>
    %114 = math.tanh %113 : vector<32x128xf32>
    %115 = arith.truncf %114 : vector<32x128xf32> to vector<32x128xbf16>
    %cst_60 = arith.constant dense<0.000000e+00> : vector<32x128xf32>
    %116 = tpu.matmul %2, %115, %cst_60 {dimension_numbers = #tpu.dot_dimension_numbers<[1], [0], [0], [1], [0, 0, 1, 1], [], []>} : vector<32x32xbf16>, vector<32x128xbf16>, vector<32x128xf32> -> vector<32x128xf32>
    %117 = arith.addf %116, %6 : vector<32x128xf32>
    %118 = math.tanh %117 : vector<32x128xf32>
    %119 = arith.truncf %118 : vector<32x128xf32> to vector<32x128xbf16>
    %120 = tpu.concatenate %115, %119 in 0 : vector<32x128xbf16>, vector<32x128xbf16> -> vector<64x128xbf16>
    %cst_61 = arith.constant dense<0.000000e+00> : vector<1x128xf32>
    %121 = tpu.matmul %3, %120, %cst_61 {dimension_numbers = #tpu.dot_dimension_numbers<[1], [0], [0], [1], [0, 0, 1, 1], [], []>} : vector<1x64xbf16>, vector<64x128xbf16>, vector<1x128xf32> -> vector<1x128xf32>
    %122 = arith.addf %108, %121 : vector<1x128xf32>
    %c0_62 = arith.constant 0 : index
    %c0_63 = arith.constant 0 : index
    %123 = vector.load %arg9[%c0_62, %c0_63] : memref<1x128xf32, #tpu.memory_space<vmem>>, vector<1x128xf32>
    tpu.vector_store %arg9[%c0_62, %c0_63], %122 {strides = array<i32>} : memref<1x128xf32, #tpu.memory_space<vmem>>, vector<1x128xf32>,
    return
  }
  func.func @transform_0(%arg0: i32) -> (i32, i32, i32) {
    %c0_i32 = arith.constant 0 : i32
    %c0_i32_0 = arith.constant 0 : i32
    %c0_i32_1 = arith.constant 0 : i32
    return %c0_i32, %c0_i32_0, %arg0 : i32, i32, i32
  }
  func.func @transform_1(%arg0: i32) -> (i32, i32) {
    %c0_i32 = arith.constant 0 : i32
    %c0_i32_0 = arith.constant 0 : i32
    return %c0_i32, %arg0 : i32, i32
  }
  func.func @transform_2(%arg0: i32) -> (i32, i32) {
    %c0_i32 = arith.constant 0 : i32
    %c0_i32_0 = arith.constant 0 : i32
    return %c0_i32, %arg0 : i32, i32
  }
  func.func @transform_3(%arg0: i32) -> (i32, i32) {
    %c0_i32 = arith.constant 0 : i32
    %c0_i32_0 = arith.constant 0 : i32
    %c0_i32_1 = arith.constant 0 : i32
    return %c0_i32, %c0_i32_0 : i32, i32
  }
  func.func @transform_4(%arg0: i32) -> (i32, i32) {
    %c0_i32 = arith.constant 0 : i32
    %c0_i32_0 = arith.constant 0 : i32
    %c0_i32_1 = arith.constant 0 : i32
    return %c0_i32, %c0_i32_0 : i32, i32
  }
  func.func @transform_5(%arg0: i32) -> (i32, i32) {
    %c0_i32 = arith.constant 0 : i32
    %c0_i32_0 = arith.constant 0 : i32
    %c0_i32_1 = arith.constant 0 : i32
    return %c0_i32, %c0_i32_0 : i32, i32
  }
  func.func @transform_6(%arg0: i32) -> (i32, i32) {
    %c0_i32 = arith.constant 0 : i32
    %c0_i32_0 = arith.constant 0 : i32
    %c0_i32_1 = arith.constant 0 : i32
    return %c0_i32, %c0_i32_0 : i32, i32
  }
  func.func @transform_7(%arg0: i32) -> (i32, i32) {
    %c0_i32 = arith.constant 0 : i32
    %c0_i32_0 = arith.constant 0 : i32
    %c0_i32_1 = arith.constant 0 : i32
    return %c0_i32, %c0_i32_0 : i32, i32
  }
  func.func @transform_8(%arg0: i32) -> (i32, i32) {
    %c0_i32 = arith.constant 0 : i32
    %c0_i32_0 = arith.constant 0 : i32
    return %c0_i32, %arg0 : i32, i32
  }
}

</mosaic_0001>

<bundles_post_ra>
// kernel: _plan_impl.3
= control target key start
LH: loop header
LB: loop body
LE: loop exit
PB: predicated region body
PF: predicated region fallthrough
CT: control target
= control target key end

     0   :  { %s3165_s27 = smov 0   ;;  %s3167_s28 = smov 0   ;;  %s3556_s0 = inlined_call_operand.vmem [shape: bf16[8,8,256], index: 0, kind: input, shape index: {}]   ;;  %s3557_s1 = inlined_call_operand.vmem [shape: bf16[32,256], index: 1, kind: input, shape index: {}]   ;;  %s3558_s2 = inlined_call_operand.vmem [shape: bf16[32,256], index: 2, kind: input, shape index: {}]   ;;  %s3559_s3 = inlined_call_operand.vmem [shape: bf16[32,8], index: 3, kind: input, shape index: {}]   ;;  %s3560_s4 = inlined_call_operand.vmem [shape: bf16[32,64], index: 4, kind: input, shape index: {}]   ;;  %s3561_s5 = inlined_call_operand.vmem [shape: bf16[32,32], index: 5, kind: input, shape index: {}]   ;;  %s3562_s6 = inlined_call_operand.vmem [shape: f32[32,1], index: 6, kind: input, shape index: {}]   ;;  %s3563_s7 = inlined_call_operand.vmem [shape: bf16[1,64], index: 7, kind: input, shape index: {}]   ;;  %s3564_s8 = inlined_call_operand.vmem [shape: f32[1,256], index: 8, kind: output, shape index: {}]  }
   0x1   :  { %s3169_s29 = smov 0  }
   0x2 LB: > { %s2375_s30 = sadd.s32 4294967295, %s3115_s29   ;;  %s3182_s9 = sadd.s32 1, %s3115_s29   ;;  %s3115_s29 = sphi %s3169_s29, %s3568_s29   ;;  %s3111_s28 = sphi %s3167_s28, %s3567_s28   ;;  %s3107_s27 = sphi %s3165_s27, %s3566_s27  }
   0x3   : > { %s22_s10 = ssub.s32 %s3115_s29, %s3182_s9  ;;  %s25_s11 = sadd.s32 1, %s3111_s28 }
   0x4   : > { %p23_p0 = scmp.eq.s32.totalorder %s22_s10, 0  ;;  %p32_p1 = scmp.ne.s32.totalorder %s3111_s28, %s3107_s27 }
   0x5   : > { %p33_p2 = scmp.eq.s32.totalorder %s3115_s29, 0  ;;  %p2378_p4 = scmp.ge.s32.totalorder %s3115_s29, 2 }
   0x6   : > { %s3191_s12 = scalar_select %p23_p0, %s3111_s28, %s25_s11  }
   0x7   : > { %p3193_p3 = por %p33_p2, %p32_p1  ;;  %256 = sbr.rel (%p2378_p4) target bundleno = 33 (0x21), region = 36 }
   0xc   : > { %259 = sbr.rel (!%p3193_p3) target bundleno = 21 (0x15), region = 40  ;;  %s261_s14 = sand.u32 (%p3193_p3), 1, %s3111_s28  }
   0xd   : > { %s2380_s15 = sshll.u32 (%p3193_p3), %s3115_s29, 2  ;;  %s2379_s16 = sshll.u32 (%p3193_p3), %s261_s14, 5 }
   0xe   : > { %s265_s19 = scalar_lea.vmem (%p3193_p3), %s3556_s0, %s2380_s15  ;;  %s263_s20 = scalar_lea.vmem (%p3193_p3), [#allocation2], %s2379_s16 }
   0xf   : > { %v282_v0 = vld [vmem:[%s265_s19] sm:$0xf] (%p3193_p3)  ;;  %v284_v1 = vld [vmem:[%s265_s19 + $0x8] sm:$0xf] (%p3193_p3)  ;;  %v286_v2 = vld [vmem:[%s265_s19 + $0x10] sm:$0xf] (%p3193_p3) }
  0x10   : > { %283 = vst [vmem:[%s263_s20] sm:$0xf] (%p3193_p3), %v282_v0  ;;  %285 = vst [vmem:[%s263_s20 + $0x4] sm:$0xf] (%p3193_p3), %v284_v1  ;;  %v288_v3 = vld [vmem:[%s265_s19 + $0x18] sm:$0xf] (%p3193_p3) }
  0x11   : > { %v290_v4 = vld [vmem:[%s265_s19 + $0x20] sm:$0xf]  ;;  %287 = vst [vmem:[%s263_s20 + $0x8] sm:$0xf] %v286_v2  ;;  %289 = vst [vmem:[%s263_s20 + $0xc] sm:$0xf] %v288_v3 }
  0x12   : > { %291 = vst [vmem:[%s263_s20 + $0x10] sm:$0xf] %v290_v4  ;;  %v292_v5 = vld [vmem:[%s265_s19 + $0x28] sm:$0xf]  ;;  %v294_v6 = vld [vmem:[%s265_s19 + $0x30] sm:$0xf] }
  0x13   : > { %v296_v7 = vld [vmem:[%s265_s19 + $0x38] sm:$0xf]  ;;  %293 = vst [vmem:[%s263_s20 + $0x14] sm:$0xf] %v292_v5  ;;  %295 = vst [vmem:[%s263_s20 + $0x18] sm:$0xf] %v294_v6 }
  0x14   : > { %297 = vst [vmem:[%s263_s20 + $0x1c] sm:$0xf] %v296_v7 }
  0x15 PF: > { %337 = sbr.rel (!%p3193_p3) target bundleno = 27 (0x1b), region = 81  ;;  %s339_s21 = sand.u32 (%p3193_p3), 1, %s3111_s28  }
  0x16   : > { %s2382_s22 = sshll.u32 (%p3193_p3), %s3115_s29, 2  ;;  %s2381_s23 = sshll.u32 (%p3193_p3), %s339_s21, 4 }
  0x17   : > { %s343_s26 = scalar_lea.vmem (%p3193_p3), %s3557_s1, %s2382_s22  ;;  %s341_s10 = scalar_lea.vmem (%p3193_p3), [#allocation3], %s2381_s23 }
  0x18   : > { %v360_v8 = vld [vmem:[%s343_s26] sm:$0xf] (%p3193_p3)  ;;  %v362_v9 = vld [vmem:[%s343_s26 + $0x8] sm:$0xf] (%p3193_p3)  ;;  %v364_v10 = vld [vmem:[%s343_s26 + $0x10] sm:$0xf] (%p3193_p3) }
  0x19   : > { %361 = vst [vmem:[%s341_s10] sm:$0xf] (%p3193_p3), %v360_v8  ;;  %363 = vst [vmem:[%s341_s10 + $0x4] sm:$0xf] (%p3193_p3), %v362_v9  ;;  %v366_v11 = vld [vmem:[%s343_s26 + $0x18] sm:$0xf] (%p3193_p3) }
  0x1a   : > { %365 = vst [vmem:[%s341_s10 + $0x8] sm:$0xf] %v364_v10  ;;  %367 = vst [vmem:[%s341_s10 + $0xc] sm:$0xf] %v366_v11 }
  0x1b PF: > { %399 = sbr.rel (!%p3193_p3) target bundleno = 33 (0x21), region = 122  ;;  %s401_s11 = sand.u32 (%p3193_p3), 1, %s3111_s28  }
  0x1c   : > { %s2384_s14 = sshll.u32 (%p3193_p3), %s3115_s29, 2  ;;  %s2383_s15 = sshll.u32 (%p3193_p3), %s401_s11, 4 }
  0x1d   : > { %s405_s18 = scalar_lea.vmem (%p3193_p3), %s3558_s2, %s2384_s14  ;;  %s403_s19 = scalar_lea.vmem (%p3193_p3), [#allocation4], %s2383_s15 }
  0x1e   : > { %v422_v12 = vld [vmem:[%s405_s18] sm:$0xf] (%p3193_p3)  ;;  %v424_v13 = vld [vmem:[%s405_s18 + $0x8] sm:$0xf] (%p3193_p3)  ;;  %v426_v14 = vld [vmem:[%s405_s18 + $0x10] sm:$0xf] (%p3193_p3) }
  0x1f   : > { %423 = vst [vmem:[%s403_s19] sm:$0xf] (%p3193_p3), %v422_v12  ;;  %425 = vst [vmem:[%s403_s19 + $0x4] sm:$0xf] (%p3193_p3), %v424_v13  ;;  %v428_v15 = vld [vmem:[%s405_s18 + $0x18] sm:$0xf] (%p3193_p3) }
  0x20   : > { %427 = vst [vmem:[%s403_s19 + $0x8] sm:$0xf] %v426_v14  ;;  %429 = vst [vmem:[%s403_s19 + $0xc] sm:$0xf] %v428_v15 }
  0x21 PF: > { %p2385_p5 = scmp.ge.s32.totalorder %s3115_s29, 1  ;;  %p460_p6 = scmp.lt.s32.totalorder %s3115_s29, 3 }
  0x23   : > { %p461_p7 = pnand %p2385_p5, %p460_p6 }
  0x24   : > { %s467_s13 = sand.u32 (!%p461_p7), 1, %s3107_s27   ;;  %p520_p8 = scmp.lt.s32.totalorder (!%p461_p7), %s2375_s30, 1 }
  0x25   : > { %464 = sbr.rel (%p461_p7) target bundleno = 3947 (0xf6b), region = 163  ;;  %s2387_s22 = sshll.u32 (!%p461_p7), %s467_s13, 4 }
  0x26   : > { %s476_s23 = scalar_lea.vmem (!%p461_p7), [#allocation3], %s2387_s22  ;;  %s483_s24 = scalar_lea.vmem (!%p461_p7), [#allocation4], %s2387_s22 }
  0x27   : > { %s2386_s25 = sshll.u32 (!%p461_p7), %s467_s13, 5 }
  0x28   : > { %s3229_s27 = scalar_lea.vmem (!%p461_p7), [#allocation2], %s2386_s25 }
  0x2a   : > { %v3225_v16 = vld [vmem:[%s3560_s4] sm:$0xff]   ;;  %vm604_vm0 = vcmask 523264   ;;  %v2949_v17 = vld [vmem:[%s483_s24 + $0x8] sm:$0xff]   ;;  %vm677_vm1 = vcmask 1043456   ;;  %vm670_vm2 = vcmask 64512   ;;  %vm746_vm3 = vcmask 261120  }
  0x2b   : > { %2616 = vmatprep.mubr.msk.bf16.mxu0 %vm604_vm0, %v3225_v16  ;;  %v2950_v18 = vld [vmem:[%s483_s24] sm:$0xff]   ;;  %2608 = vmatprep.subr.bf16.mxu0 %v2949_v17  ;;  %v2951_v19 = vld [vmem:[%s476_s23 + $0x8] sm:$0xff]   ;;  %v3117_v29 = vmov 0   ;;  %v3118_v7 = vmov 0.0   ;;  %vm3119_vm4 = vmmov 0   ;;  %s3570_s30 = smov (!%p520_p8, %s2375_s30), 1 }
  0x2c   : > { %2609 = vmatpush3.bf16.msra.mxu0 %v2949_v17  ;;  %v2952_v20 = vld [vmem:[%s476_s23] sm:$0xff]   ;;  %v3235_v22 = vld [vmem:[%s3560_s4 + $0x8] sm:$0xff]   ;;  %2947 = vset.pattern.permute.xlu0 %v3117_v29  ;;  %v540_v30 = vld [vmem:[%s3562_s6 + $0x18] sm:$0xff]  ;;  %s522_s10 = scalar_lea.vmem %s3564_s8, %s3570_s30 }
  0x2d   : > { %2610 = vmatprep.subr.bf16.mxu0 %v2950_v18  ;;  %v593_v21 = vld [vmem:[%s3229_s27] sm:$0xf]  ;;  %v3251_v25 = vld [vmem:[%s3559_s3 + $0x8] sm:$0xff]   ;;  %v539_v27 = vld [vmem:[%s3562_s6 + $0x10] sm:$0xff]  ;;  %2948 = vset.pattern.permute.xlu1 %v3117_v29 }
  0x2e   : > { %v3240_v23 = vld [vmem:[%s3559_s3] sm:$0xff]   ;;  %v679_v24 = vsel %vm677_vm1, %v593_v21, 0  ;;  %553 = vperm.xlu0 %2947, %v539_v27   ;;  %v538_v31 = vld [vmem:[%s3562_s6 + $0x8] sm:$0xff] }
  0x2f   : > { %v3260_v26 = vld [vmem:[%s3561_s5] sm:$0xff]   ;;  %v3286_v50 = vld [vmem:[%s3561_s5 + $0x8] sm:$0xff]  }
  0x30   : > { %2611 = vmatpush3.bf16.msra.mxu0 %v2950_v18  ;;  %2630 = vmatprep.mubr.msk.bf16.mxu1 %vm746_vm3, %v3260_v26  ;;  %v537_v28 = vld [vmem:[%s3562_s6] sm:$0xff] }
  0x31   : > { %2612 = vmatprep.subr.bf16.mxu0 %v2951_v19  ;;  %543 = vperm.xlu1 %2948, %v537_v28   ;;  %v2405_v51 = vld [vmem:[%s3229_s27 + $0x4] sm:$0xf] }
  0x32   : > { %558 = vperm.xlu0 %2947, %v540_v30   ;;  %v860_v52 = vsel %vm677_vm1, %v2405_v51, 0 }
  0x34   : > { %2613 = vmatpush3.bf16.msra.mxu0 %v2951_v19 }
  0x35   : > { %2614 = vmatprep.subr.bf16.mxu0 %v2952_v20  ;;  %548 = vperm.xlu1 %2948, %v538_v31   ;;  %v3330_v31 = vld [vmem:[%s3563_s7] sm:$0x1] }
  0x38   : > { %2615 = vmatpush3.bf16.msra.mxu0 %v2952_v20 }
  0x39   : > { %2912 = vmatprep.subr.msk.bf16.mxu0 %vm677_vm1, %v593_v21 }
  0x3b   : > { %2617 = vmatmul.mubr.msk.bf16.vlgmr.msra.gmra.mxu0 %vm604_vm0, %v3235_v22 }
  0x3c   : > { %2621 = vmatpush3.bf16.msra.mxu0 %v679_v24  ;;  %2622 = vmatprep.mubr.msk.bf16.mxu0 %vm670_vm2, %v3240_v23 }
  0x3d   : > { %2913 = vmatprep.subr.msk.bf16.mxu0 %vm677_vm1, %v2405_v51 }
  0x43   : > { %2623 = vmatmul.mubr.msk.bf16.vlgmr.msra.gmra.mxu0 %vm670_vm2, %v3251_v25 }
  0x44   : > { %2648 = vmatprep.mubr.msk.bf16.mxu0 %vm670_vm2, %v3240_v23  ;;  %2647 = vmatpush3.bf16.msra.mxu0 %v860_v52 }
  0x4b   : > { %2649 = vmatmul.mubr.msk.bf16.vlgmr.msra.gmra.mxu0 %vm670_vm2, %v3251_v25 }
  0x4c   : > { %2656 = vmatprep.mubr.msk.bf16.mxu0 %vm746_vm3, %v3260_v26 }
  0xa9   : > { %v3300_v53 = vpop.permute.xlu0 %553 }
  0xac   : > { %v3302_v54 = vpop.permute.xlu1 %543 }
  0xad   : > { %v3305_v58 = vpop.permute.xlu0 %558 }
  0xb0   : > { %v3309_v62 = vpop.permute.xlu1 %548 }
  0xfb   : > { %v2618_v32 = vpop.f32.mrf.mxu0 }
  0xfd   : > { %v645_v33 = vpop.f32.mrf.mxu0 }
  0xff   : > { %v2619_v34 = vpop.f32.mrf.mxu0 }
 0x101   : > { %v648_v35 = vpop.f32.mrf.mxu0 }
 0x103   : > { %v2624_v36 = vpop.f32.mrf.mxu0 }
 0x104   : > { %v724_v37 = vadd.f32 %v2624_v36, %v2618_v32  ;;  %v2414_v32 = vld [vmem:[%s3229_s27 + $0x8] sm:$0xf] }
 0x105   : > { %v715_v38 = vpop.f32.mrf.mxu0 }
 0x106   : > { %v716_v39 = vadd.f32 %v715_v38, %v645_v33  ;;  %2959 = vtanh.f32 %v724_v37  ;;  %v1107_v33 = vsel %vm677_vm1, %v2414_v32, 0 }
 0x107   : > { %v2625_v40 = vpop.f32.mrf.mxu0 }
 0x108   : > { %v727_v41 = vadd.f32 %v2625_v40, %v2619_v34 }
 0x109   : > { %v718_v42 = vpop.f32.mrf.mxu0 }
 0x10a   : > { %2961 = vtanh.f32 %v727_v41  ;;  %v719_v43 = vadd.f32 %v718_v42, %v648_v35 }
 0x10b   : > { %2963 = vtanh.f32 %v716_v39  ;;  %v2650_v8 = vpop.f32.mrf.mxu0 }
 0x10c   : > { %2965 = vtanh.f32 %v719_v43 }
 0x10d   : > { %v896_v9 = vpop.f32.mrf.mxu0 }
 0x10f   : > { %v2651_v11 = vpop.f32.mrf.mxu0 }
 0x111   : > { %v899_v18 = vpop.f32.mrf.mxu0 }
 0x113   : > { %v2960_v44 = vpop.eup %2959 }
 0x117   : > { %v2962_v45 = vpop.eup %2961 }
 0x118   : > { %v2964_v46 = vpop.eup %2963  ;;  %v3276_v47 = vpack.c.bf16 %v2962_v45, %v2960_v44 }
 0x119   : > { %v2966_v48 = vpop.eup %2965 }
 0x11a   : > { %2626 = vmatprep.subr.bf16.mxu1 %v3276_v47  ;;  %v3279_v49 = vpack.c.bf16 %v2966_v48, %v2964_v46 }
 0x11b   : > { %2627 = vmatpush3.bf16.msra.mxu1 %v3276_v47 }
 0x11c   : > { %2628 = vmatprep.subr.bf16.mxu1 %v3279_v49 }
 0x11f   : > { %2629 = vmatpush3.bf16.msra.mxu1 %v3279_v49 }
 0x122   : > { %2631 = vmatmul.mubr.msk.bf16.vlgmr.msra.gmra.mxu1 %vm746_vm3, %v3286_v50 }
 0x123   : > { %2642 = vmatprep.mubr.msk.bf16.mxu1 %vm604_vm0, %v3225_v16 }
 0x1e2   : > { %v2632_v55 = vpop.f32.mrf.mxu1 }
 0x1e3   : > { %v796_v56 = vadd.f32 %v2632_v55, %v3300_v53 }
 0x1e4   : > { %v787_v57 = vpop.f32.mrf.mxu1 }
 0x1e5   : > { %v788_v59 = vadd.f32 %v787_v57, %v3302_v54  ;;  %2967 = vtanh.f32 %v796_v56 }
 0x1e6   : > { %v2633_v60 = vpop.f32.mrf.mxu1 }
 0x1e7   : > { %v799_v61 = vadd.f32 %v2633_v60, %v3305_v58 }
 0x1e8   : > { %v790_v63 = vpop.f32.mrf.mxu1 }
 0x1e9   : > { %2969 = vtanh.f32 %v799_v61  ;;  %v791_v0 = vadd.f32 %v790_v63, %v3309_v62 }
 0x1ea   : > { %2971 = vtanh.f32 %v788_v59 }
 0x1eb   : > { %2973 = vtanh.f32 %v791_v0 }
 0x1f2   : > { %v2968_v1 = vpop.eup %2967 }
 0x1f6   : > { %v2970_v2 = vpop.eup %2969 }
 0x1f7   : > { %v2972_v3 = vpop.eup %2971  ;;  %v807_v4 = vpack.c.bf16 %v2970_v2, %v2968_v1 }
 0x1f8   : > { %v2974_v5 = vpop.eup %2973 }
 0x1f9   : > { %2634 = vmatprep.subr.bf16.mxu1 %v807_v4  ;;  %v806_v6 = vpack.c.bf16 %v2974_v5, %v2972_v3 }
 0x1fa   : > { %2635 = vmatpush3.bf16.msra.mxu1 %v807_v4 }
 0x1fb   : > { %2636 = vmatprep.subr.bf16.mxu1 %v806_v6 }
 0x1fe   : > { %2637 = vmatpush3.bf16.msra.mxu1 %v806_v6 }
 0x1ff   : > { %2638 = vmatprep.subr.bf16.mxu1 %v3276_v47 }
 0x202   : > { %2639 = vmatpush3.bf16.msra.mxu1 %v3276_v47 }
 0x203   : > { %2640 = vmatprep.subr.bf16.mxu1 %v3279_v49 }
 0x206   : > { %2641 = vmatpush3.bf16.msra.mxu1 %v3279_v49 }
 0x207   : > { %2660 = vmatprep.subr.bf16.mxu1 %v3118_v7 }
 0x209   : > { %2643 = vmatmul.mubr.msk.bf16.vlgmr.msra.gmra.mxu1 %vm604_vm0, %v3235_v22 }
 0x20a   : > { %2668 = vmatprep.mubr.msk.bf16.mxu1 %vm3119_vm4, %v3118_v7 }
 0x2c9   : > { %v2644_v10 = vpop.f32.mrf.mxu1 }
 0x2ca   : > { %v905_v12 = vadd.f32 %v2650_v8, %v2644_v10 }
 0x2cb   : > { %v844_v13 = vpop.f32.mrf.mxu1 }
 0x2cc   : > { %v897_v14 = vadd.f32 %v896_v9, %v844_v13  ;;  %2975 = vtanh.f32 %v905_v12 }
 0x2cd   : > { %v2645_v15 = vpop.f32.mrf.mxu1 }
 0x2ce   : > { %v908_v17 = vadd.f32 %v2651_v11, %v2645_v15 }
 0x2cf   : > { %v847_v19 = vpop.f32.mrf.mxu1 }
 0x2d0   : > { %2977 = vtanh.f32 %v908_v17  ;;  %v900_v20 = vadd.f32 %v899_v18, %v847_v19 }
 0x2d1   : > { %2979 = vtanh.f32 %v897_v14 }
 0x2d2   : > { %2981 = vtanh.f32 %v900_v20 }
 0x2d9   : > { %v2976_v21 = vpop.eup %2975 }
 0x2dd   : > { %v2978_v24 = vpop.eup %2977 }
 0x2de   : > { %v2980_v27 = vpop.eup %2979  ;;  %v916_v28 = vpack.c.bf16 %v2978_v24, %v2976_v21 }
 0x2df   : > { %v2982_v29 = vpop.eup %2981 }
 0x2e0   : > { %2652 = vmatprep.subr.bf16.mxu0 %v916_v28  ;;  %v915_v30 = vpack.c.bf16 %v2982_v29, %v2980_v27 }
 0x2e1   : > { %2653 = vmatpush3.bf16.msra.mxu0 %v916_v28 }
 0x2e2   : > { %2654 = vmatprep.subr.bf16.mxu0 %v915_v30 }
 0x2e5   : > { %2655 = vmatpush3.bf16.msra.mxu0 %v915_v30 }
 0x2e6   : > { %2672 = vmatprep.subr.bf16.mxu0 %v3118_v7 }
 0x2e8   : > { %2657 = vmatmul.mubr.msk.bf16.vlgmr.msra.gmra.mxu0 %vm746_vm3, %v3286_v50 }
 0x2e9   : > { %2673 = vmatpush3.bf16.msra.mxu0 %v807_v4  ;;  %2680 = vmatprep.mubr.msk.bf16.mxu0 %vm3119_vm4, %v3118_v7 }
 0x2ea   : > { %2674 = vmatprep.subr.bf16.mxu0 %v3118_v7 }
 0x2ed   : > { %2675 = vmatpush3.bf16.msra.mxu0 %v806_v6 }
 0x2ee   : > { %2676 = vmatprep.subr.bf16.mxu0 %v3118_v7 }
 0x2f1   : > { %2677 = vmatpush3.bf16.msra.mxu0 %v3276_v47 }
 0x2f2   : > { %2678 = vmatprep.subr.bf16.mxu0 %v3118_v7 }
 0x2f5   : > { %2679 = vmatpush3.bf16.msra.mxu0 %v3279_v49 }
 0x2f6   : > { %2914 = vmatprep.subr.msk.bf16.mxu0 %vm677_vm1, %v2414_v32 }
 0x2f8   : > { %2681 = vmatmul.mubr.msk.bf16.vlgmr.msra.gmra.mxu0 %vm604_vm0, %v3330_v31 }
 0x2f9   : > { %2698 = vmatprep.mubr.msk.bf16.mxu0 %vm670_vm2, %v3240_v23  ;;  %2697 = vmatpush3.bf16.msra.mxu0 %v1107_v33 }
 0x300   : > { %2699 = vmatmul.mubr.msk.bf16.vlgmr.msra.gmra.mxu0 %vm670_vm2, %v3251_v25 }
 0x301   : > { %2706 = vmatprep.mubr.msk.bf16.mxu0 %vm746_vm3, %v3260_v26 }
 0x3a8   : > { %v2658_v34 = vpop.f32.mrf.mxu0 }
 0x3a9   : > { %v960_v35 = vadd.f32 %v2658_v34, %v3300_v53 }
 0x3aa   : > { %v951_v36 = vpop.f32.mrf.mxu0 }
 0x3ab   : > { %2983 = vtanh.f32 %v960_v35  ;;  %v952_v40 = vadd.f32 %v951_v36, %v3302_v54  ;;  %v2422_v36 = vld [vmem:[%s3229_s27 + $0xc] sm:$0xf] }
 0x3ac   : > { %v2659_v37 = vpop.f32.mrf.mxu0 }
 0x3ad   : > { %v963_v38 = vadd.f32 %v2659_v37, %v3305_v58  ;;  %v1312_v37 = vsel %vm677_vm1, %v2422_v36, 0 }
 0x3ae   : > { %v954_v39 = vpop.f32.mrf.mxu0 }
 0x3af   : > { %2985 = vtanh.f32 %v963_v38  ;;  %v955_v41 = vadd.f32 %v954_v39, %v3309_v62 }
 0x3b1   : > { %2987 = vtanh.f32 %v955_v41 }
 0x3b2   : > { %2989 = vtanh.f32 %v952_v40 }
 0x3b8   : > { %v2984_v42 = vpop.eup %2983  ;;  %v3363_v48 = vpop.f32.mrf.mxu0 }
 0x3ba   : > { %v2682_v49 = vpop.f32.mrf.mxu0 }
 0x3bc   : > { %v2986_v43 = vpop.eup %2985  ;;  %v1052_v51 = vpop.f32.mrf.mxu0 }
 0x3bd   : > { %v971_v44 = vpack.c.bf16 %v2986_v43, %v2984_v42 }
 0x3be   : > { %v2988_v45 = vpop.eup %2987  ;;  %v2683_v52 = vpop.f32.mrf.mxu0 }
 0x3bf   : > { %2661 = vmatpush3.bf16.msra.mxu1 %v971_v44  ;;  %v2990_v46 = vpop.eup %2989 }
 0x3c0   : > { %2662 = vmatprep.subr.bf16.mxu1 %v3118_v7  ;;  %v970_v47 = vpack.c.bf16 %v2988_v45, %v2990_v46  ;;  %v2700_v60 = vpop.f32.mrf.mxu0 }
 0x3c2   : > { %v1143_v61 = vpop.f32.mrf.mxu0 }
 0x3c3   : > { %2663 = vmatpush3.bf16.msra.mxu1 %v970_v47 }
 0x3c4   : > { %2664 = vmatprep.subr.bf16.mxu1 %v3118_v7  ;;  %v2701_v0 = vpop.f32.mrf.mxu0 }
 0x3c6   : > { %v1146_v6 = vpop.f32.mrf.mxu0 }
 0x3c7   : > { %2665 = vmatpush3.bf16.msra.mxu1 %v916_v28 }
 0x3c8   : > { %2666 = vmatprep.subr.bf16.mxu1 %v3118_v7 }
 0x3cb   : > { %2667 = vmatpush3.bf16.msra.mxu1 %v915_v30 }
 0x3cc   : > { %2684 = vmatprep.subr.bf16.mxu1 %v971_v44 }
 0x3ce   : > { %2669 = vmatmul.mubr.msk.bf16.vlgmr.msra.gmra.mxu1 %vm604_vm0, %v3330_v31 }
 0x3cf   : > { %2685 = vmatpush3.bf16.msra.mxu1 %v971_v44  ;;  %2692 = vmatprep.mubr.msk.bf16.mxu1 %vm604_vm0, %v3225_v16 }
 0x3d0   : > { %2686 = vmatprep.subr.bf16.mxu1 %v970_v47 }
 0x3d3   : > { %2687 = vmatpush3.bf16.msra.mxu1 %v970_v47 }
 0x3d4   : > { %2688 = vmatprep.subr.bf16.mxu1 %v916_v28 }
 0x3d7   : > { %2689 = vmatpush3.bf16.msra.mxu1 %v916_v28 }
 0x3d8   : > { %2690 = vmatprep.subr.bf16.mxu1 %v915_v30 }
 0x3db   : > { %2691 = vmatpush3.bf16.msra.mxu1 %v915_v30 }
 0x3dc   : > { %2710 = vmatprep.subr.bf16.mxu1 %v3118_v7 }
 0x3de   : > { %2693 = vmatmul.mubr.msk.bf16.vlgmr.msra.gmra.mxu1 %vm604_vm0, %v3235_v22 }
 0x3df   : > { %2718 = vmatprep.mubr.msk.bf16.mxu1 %vm3119_vm4, %v3118_v7 }
 0x48e   : > { %v3365_v55 = vpop.f32.mrf.mxu1 }
 0x48f   : > { %v1050_v38 = vadd.f32 %v3363_v48, %v3365_v55 }
 0x490   : > { %v2670_v56 = vpop.f32.mrf.mxu1 }
 0x492   : > { %v1012_v57 = vpop.f32.mrf.mxu1 }
 0x494   : > { %v2671_v59 = vpop.f32.mrf.mxu1 }
 0x49e   : > { %v2694_v63 = vpop.f32.mrf.mxu1 }
 0x49f   : > { %v1152_v1 = vadd.f32 %v2700_v60, %v2694_v63 }
 0x4a0   : > { %v1091_v2 = vpop.f32.mrf.mxu1 }
 0x4a1   : > { %v1144_v3 = vadd.f32 %v1143_v61, %v1091_v2  ;;  %2991 = vtanh.f32 %v1152_v1 }
 0x4a2   : > { %v2695_v4 = vpop.f32.mrf.mxu1 }
 0x4a3   : > { %v1155_v5 = vadd.f32 %v2701_v0, %v2695_v4 }
 0x4a4   : > { %v1094_v8 = vpop.f32.mrf.mxu1 }
 0x4a5   : > { %2993 = vtanh.f32 %v1155_v5  ;;  %v1147_v9 = vadd.f32 %v1146_v6, %v1094_v8 }
 0x4a6   : > { %2995 = vtanh.f32 %v1144_v3 }
 0x4a7   : > { %2997 = vtanh.f32 %v1147_v9 }
 0x4ae   : > { %v2992_v10 = vpop.eup %2991 }
 0x4b2   : > { %v2994_v11 = vpop.eup %2993 }
 0x4b3   : > { %v2996_v12 = vpop.eup %2995  ;;  %v1163_v13 = vpack.c.bf16 %v2994_v11, %v2992_v10 }
 0x4b4   : > { %v2998_v14 = vpop.eup %2997 }
 0x4b5   : > { %2702 = vmatprep.subr.bf16.mxu0 %v1163_v13  ;;  %v1162_v15 = vpack.c.bf16 %v2998_v14, %v2996_v12 }
 0x4b6   : > { %2703 = vmatpush3.bf16.msra.mxu0 %v1163_v13 }
 0x4b7   : > { %2704 = vmatprep.subr.bf16.mxu0 %v1162_v15 }
 0x4ba   : > { %2705 = vmatpush3.bf16.msra.mxu0 %v1162_v15 }
 0x4bd   : > { %2707 = vmatmul.mubr.msk.bf16.vlgmr.msra.gmra.mxu0 %vm746_vm3, %v3286_v50 }
 0x4be   : > { %2730 = vmatprep.mubr.msk.bf16.mxu0 %vm604_vm0, %v3225_v16 }
 0x57d   : > { %v2708_v17 = vpop.f32.mrf.mxu0 }
 0x57e   : > { %v1207_v18 = vadd.f32 %v2708_v17, %v3300_v53 }
 0x57f   : > { %v1198_v19 = vpop.f32.mrf.mxu0 }
 0x580   : > { %v1199_v20 = vadd.f32 %v1198_v19, %v3302_v54  ;;  %2999 = vtanh.f32 %v1207_v18  ;;  %v2430_v19 = vld [vmem:[%s3229_s27 + $0x10] sm:$0xf] }
 0x581   : > { %v2709_v21 = vpop.f32.mrf.mxu0 }
 0x582   : > { %v1210_v24 = vadd.f32 %v2709_v21, %v3305_v58 }
 0x583   : > { %v1201_v27 = vpop.f32.mrf.mxu0 }
 0x584   : > { %3001 = vtanh.f32 %v1210_v24  ;;  %v1202_v28 = vadd.f32 %v1201_v27, %v3309_v62 }
 0x585   : > { %3003 = vtanh.f32 %v1199_v20  ;;  %v1517_v20 = vsel %vm677_vm1, %v2430_v19, 0 }
 0x586   : > { %3005 = vtanh.f32 %v1202_v28 }
 0x58d   : > { %v3000_v29 = vpop.eup %2999 }
 0x591   : > { %v3002_v30 = vpop.eup %3001 }
 0x592   : > { %v3004_v32 = vpop.eup %3003  ;;  %v1218_v33 = vpack.c.bf16 %v3002_v30, %v3000_v29 }
 0x593   : > { %v3006_v34 = vpop.eup %3005 }
 0x594   : > { %2711 = vmatpush3.bf16.msra.mxu1 %v1218_v33  ;;  %2722 = vmatprep.subr.bf16.mxu0 %v1218_v33  ;;  %v1217_v35 = vpack.c.bf16 %v3006_v34, %v3004_v32 }
 0x595   : > { %2723 = vmatpush3.bf16.msra.mxu0 %v1218_v33  ;;  %2712 = vmatprep.subr.bf16.mxu1 %v3118_v7 }
 0x596   : > { %2724 = vmatprep.subr.bf16.mxu0 %v1217_v35 }
 0x598   : > { %2713 = vmatpush3.bf16.msra.mxu1 %v1217_v35 }
 0x599   : > { %2725 = vmatpush3.bf16.msra.mxu0 %v1217_v35  ;;  %2714 = vmatprep.subr.bf16.mxu1 %v3118_v7 }
 0x59a   : > { %2726 = vmatprep.subr.bf16.mxu0 %v1163_v13 }
 0x59c   : > { %2715 = vmatpush3.bf16.msra.mxu1 %v1163_v13 }
 0x59d   : > { %2727 = vmatpush3.bf16.msra.mxu0 %v1163_v13  ;;  %2716 = vmatprep.subr.bf16.mxu1 %v3118_v7 }
 0x59e   : > { %2728 = vmatprep.subr.bf16.mxu0 %v1162_v15 }
 0x5a0   : > { %2717 = vmatpush3.bf16.msra.mxu1 %v1162_v15 }
 0x5a1   : > { %2729 = vmatpush3.bf16.msra.mxu0 %v1162_v15  ;;  %2915 = vmatprep.subr.msk.bf16.mxu1 %vm677_vm1, %v2422_v36 }
 0x5a3   : > { %2719 = vmatmul.mubr.msk.bf16.vlgmr.msra.gmra.mxu1 %vm604_vm0, %v3330_v31 }
 0x5a4   : > { %2735 = vmatpush3.bf16.msra.mxu1 %v1312_v37  ;;  %2731 = vmatmul.mubr.msk.bf16.vlgmr.msra.gmra.mxu0 %vm604_vm0, %v3235_v22 }
 0x5a5   : > { %2736 = vmatprep.mubr.msk.bf16.mxu1 %vm670_vm2, %v3240_v23  ;;  %2744 = vmatprep.mubr.msk.bf16.mxu0 %vm746_vm3, %v3260_v26 }
 0x5a6   : > { %2748 = vmatprep.subr.bf16.mxu1 %v3118_v7 }
 0x5ab   : > { %2737 = vmatmul.mubr.msk.bf16.vlgmr.msra.gmra.mxu1 %vm670_vm2, %v3251_v25 }
 0x5ac   : > { %2756 = vmatprep.mubr.msk.bf16.mxu1 %vm3119_vm4, %v3118_v7 }
 0x663   : > { %v1253_v39 = vpop.f32.mrf.mxu1 }
 0x664   : > { %v3396_v40 = vadd.f32 %v1253_v39, %v1050_v38  ;;  %v2732_v42 = vpop.f32.mrf.mxu0 }
 0x665   : > { %v2720_v41 = vpop.f32.mrf.mxu1 }
 0x666   : > { %v1296_v44 = vpop.f32.mrf.mxu0 }
 0x667   : > { %v1256_v43 = vpop.f32.mrf.mxu1 }
 0x668   : > { %v2733_v47 = vpop.f32.mrf.mxu0 }
 0x669   : > { %v2721_v45 = vpop.f32.mrf.mxu1 }
 0x66a   : > { %v1299_v59 = vpop.f32.mrf.mxu0 }
 0x66b   : > { %v2738_v46 = vpop.f32.mrf.mxu1 }
 0x66c   : > { %v1357_v49 = vadd.f32 %v2738_v46, %v2732_v42 }
 0x66d   : > { %v1348_v51 = vpop.f32.mrf.mxu1 }
 0x66e   : > { %v1349_v52 = vadd.f32 %v1348_v51, %v1296_v44  ;;  %3007 = vtanh.f32 %v1357_v49 }
 0x66f   : > { %v2739_v56 = vpop.f32.mrf.mxu1 }
 0x670   : > { %v1360_v57 = vadd.f32 %v2739_v56, %v2733_v47 }
 0x671   : > { %v1351_v60 = vpop.f32.mrf.mxu1 }
 0x672   : > { %3009 = vtanh.f32 %v1360_v57  ;;  %v1352_v48 = vadd.f32 %v1351_v60, %v1299_v59 }
 0x673   : > { %3011 = vtanh.f32 %v1349_v52 }
 0x674   : > { %3013 = vtanh.f32 %v1352_v48 }
 0x67b   : > { %v3008_v55 = vpop.eup %3007 }
 0x67f   : > { %v3010_v61 = vpop.eup %3009 }
 0x680   : > { %v3012_v63 = vpop.eup %3011  ;;  %v1368_v0 = vpack.c.bf16 %v3010_v61, %v3008_v55 }
 0x681   : > { %v3014_v1 = vpop.eup %3013 }
 0x682   : > { %2740 = vmatprep.subr.bf16.mxu0 %v1368_v0  ;;  %v1367_v2 = vpack.c.bf16 %v3014_v1, %v3012_v63 }
 0x683   : > { %2741 = vmatpush3.bf16.msra.mxu0 %v1368_v0 }
 0x684   : > { %2742 = vmatprep.subr.bf16.mxu0 %v1367_v2 }
 0x687   : > { %2743 = vmatpush3.bf16.msra.mxu0 %v1367_v2 }
 0x68a   : > { %2745 = vmatmul.mubr.msk.bf16.vlgmr.msra.gmra.mxu0 %vm746_vm3, %v3286_v50 }
 0x68b   : > { %2768 = vmatprep.mubr.msk.bf16.mxu0 %vm604_vm0, %v3225_v16 }
 0x74a   : > { %v2746_v3 = vpop.f32.mrf.mxu0 }
 0x74b   : > { %v1412_v4 = vadd.f32 %v2746_v3, %v3300_v53 }
 0x74c   : > { %v1403_v5 = vpop.f32.mrf.mxu0 }
 0x74d   : > { %v1404_v6 = vadd.f32 %v1403_v5, %v3302_v54  ;;  %3015 = vtanh.f32 %v1412_v4  ;;  %v2438_v4 = vld [vmem:[%s3229_s27 + $0x14] sm:$0xf] }
 0x74e   : > { %v2747_v8 = vpop.f32.mrf.mxu0  ;;  %v1722_v5 = vsel %vm677_vm1, %v2438_v4, 0 }
 0x74f   : > { %v1415_v9 = vadd.f32 %v2747_v8, %v3305_v58 }
 0x750   : > { %v1406_v10 = vpop.f32.mrf.mxu0 }
 0x751   : > { %3017 = vtanh.f32 %v1415_v9  ;;  %v1407_v11 = vadd.f32 %v1406_v10, %v3309_v62 }
 0x752   : > { %3019 = vtanh.f32 %v1404_v6 }
 0x753   : > { %3021 = vtanh.f32 %v1407_v11 }
 0x75a   : > { %v3016_v12 = vpop.eup %3015 }
 0x75e   : > { %v3018_v13 = vpop.eup %3017 }
 0x75f   : > { %v3020_v14 = vpop.eup %3019  ;;  %v1423_v15 = vpack.c.bf16 %v3018_v13, %v3016_v12 }
 0x760   : > { %v3022_v17 = vpop.eup %3021 }
 0x761   : > { %2749 = vmatpush3.bf16.msra.mxu1 %v1423_v15  ;;  %2760 = vmatprep.subr.bf16.mxu0 %v1423_v15  ;;  %v1422_v18 = vpack.c.bf16 %v3022_v17, %v3020_v14 }
 0x762   : > { %2761 = vmatpush3.bf16.msra.mxu0 %v1423_v15  ;;  %2750 = vmatprep.subr.bf16.mxu1 %v3118_v7 }
 0x763   : > { %2762 = vmatprep.subr.bf16.mxu0 %v1422_v18 }
 0x765   : > { %2751 = vmatpush3.bf16.msra.mxu1 %v1422_v18 }
 0x766   : > { %2763 = vmatpush3.bf16.msra.mxu0 %v1422_v18  ;;  %2752 = vmatprep.subr.bf16.mxu1 %v3118_v7 }
 0x767   : > { %2764 = vmatprep.subr.bf16.mxu0 %v1368_v0 }
 0x769   : > { %2753 = vmatpush3.bf16.msra.mxu1 %v1368_v0 }
 0x76a   : > { %2765 = vmatpush3.bf16.msra.mxu0 %v1368_v0  ;;  %2754 = vmatprep.subr.bf16.mxu1 %v3118_v7 }
 0x76b   : > { %2766 = vmatprep.subr.bf16.mxu0 %v1367_v2 }
 0x76d   : > { %2755 = vmatpush3.bf16.msra.mxu1 %v1367_v2 }
 0x76e   : > { %2767 = vmatpush3.bf16.msra.mxu0 %v1367_v2  ;;  %2916 = vmatprep.subr.msk.bf16.mxu1 %vm677_vm1, %v2430_v19 }
 0x770   : > { %2757 = vmatmul.mubr.msk.bf16.vlgmr.msra.gmra.mxu1 %vm604_vm0, %v3330_v31 }
 0x771   : > { %2773 = vmatpush3.bf16.msra.mxu1 %v1517_v20  ;;  %2769 = vmatmul.mubr.msk.bf16.vlgmr.msra.gmra.mxu0 %vm604_vm0, %v3235_v22 }
 0x772   : > { %2774 = vmatprep.mubr.msk.bf16.mxu1 %vm670_vm2, %v3240_v23  ;;  %2782 = vmatprep.mubr.msk.bf16.mxu0 %vm746_vm3, %v3260_v26 }
 0x773   : > { %2786 = vmatprep.subr.bf16.mxu1 %v3118_v7 }
 0x778   : > { %2775 = vmatmul.mubr.msk.bf16.vlgmr.msra.gmra.mxu1 %vm670_vm2, %v3251_v25 }
 0x779   : > { %2794 = vmatprep.mubr.msk.bf16.mxu1 %vm3119_vm4, %v3118_v7 }
 0x830   : > { %v1458_v21 = vpop.f32.mrf.mxu1 }
 0x831   : > { %v3426_v24 = vadd.f32 %v1458_v21, %v3396_v40  ;;  %v2770_v28 = vpop.f32.mrf.mxu0 }
 0x832   : > { %v2758_v27 = vpop.f32.mrf.mxu1 }
 0x833   : > { %v1501_v30 = vpop.f32.mrf.mxu0 }
 0x834   : > { %v1461_v29 = vpop.f32.mrf.mxu1 }
 0x835   : > { %v2771_v34 = vpop.f32.mrf.mxu0 }
 0x836   : > { %v2759_v32 = vpop.f32.mrf.mxu1 }
 0x837   : > { %v1504_v41 = vpop.f32.mrf.mxu0 }
 0x838   : > { %v2776_v33 = vpop.f32.mrf.mxu1 }
 0x839   : > { %v1562_v35 = vadd.f32 %v2776_v33, %v2770_v28 }
 0x83a   : > { %v1553_v36 = vpop.f32.mrf.mxu1 }
 0x83b   : > { %v1554_v37 = vadd.f32 %v1553_v36, %v1501_v30  ;;  %3023 = vtanh.f32 %v1562_v35 }
 0x83c   : > { %v2777_v38 = vpop.f32.mrf.mxu1 }
 0x83d   : > { %v1565_v39 = vadd.f32 %v2777_v38, %v2771_v34 }
 0x83e   : > { %v1556_v42 = vpop.f32.mrf.mxu1 }
 0x83f   : > { %3025 = vtanh.f32 %v1565_v39  ;;  %v1557_v43 = vadd.f32 %v1556_v42, %v1504_v41 }
 0x840   : > { %3027 = vtanh.f32 %v1554_v37 }
 0x841   : > { %3029 = vtanh.f32 %v1557_v43 }
 0x848   : > { %v3024_v40 = vpop.eup %3023 }
 0x84c   : > { %v3026_v44 = vpop.eup %3025 }
 0x84d   : > { %v3028_v45 = vpop.eup %3027  ;;  %v1573_v46 = vpack.c.bf16 %v3026_v44, %v3024_v40 }
 0x84e   : > { %v3030_v47 = vpop.eup %3029 }
 0x84f   : > { %2778 = vmatprep.subr.bf16.mxu0 %v1573_v46  ;;  %v1572_v49 = vpack.c.bf16 %v3030_v47, %v3028_v45 }
 0x850   : > { %2779 = vmatpush3.bf16.msra.mxu0 %v1573_v46 }
 0x851   : > { %2780 = vmatprep.subr.bf16.mxu0 %v1572_v49 }
 0x854   : > { %2781 = vmatpush3.bf16.msra.mxu0 %v1572_v49 }
 0x857   : > { %2783 = vmatmul.mubr.msk.bf16.vlgmr.msra.gmra.mxu0 %vm746_vm3, %v3286_v50 }
 0x858   : > { %2806 = vmatprep.mubr.msk.bf16.mxu0 %vm604_vm0, %v3225_v16 }
 0x917   : > { %v2784_v51 = vpop.f32.mrf.mxu0 }
 0x918   : > { %v1617_v52 = vadd.f32 %v2784_v51, %v3300_v53  ;;  %v2446_v51 = vld [vmem:[%s3229_s27 + $0x18] sm:$0xf] }
 0x919   : > { %v1608_v56 = vpop.f32.mrf.mxu0 }
 0x91a   : > { %v1609_v57 = vadd.f32 %v1608_v56, %v3302_v54  ;;  %3031 = vtanh.f32 %v1617_v52  ;;  %v1927_v52 = vsel %vm677_vm1, %v2446_v51, 0 }
 0x91b   : > { %v2785_v59 = vpop.f32.mrf.mxu0 }
 0x91c   : > { %v1620_v60 = vadd.f32 %v2785_v59, %v3305_v58 }
 0x91d   : > { %v1611_v48 = vpop.f32.mrf.mxu0 }
 0x91e   : > { %3033 = vtanh.f32 %v1620_v60  ;;  %v1612_v55 = vadd.f32 %v1611_v48, %v3309_v62 }
 0x91f   : > { %3035 = vtanh.f32 %v1609_v57 }
 0x920   : > { %3037 = vtanh.f32 %v1612_v55 }
 0x927   : > { %v3032_v61 = vpop.eup %3031 }
 0x92b   : > { %v3034_v63 = vpop.eup %3033 }
 0x92c   : > { %v3036_v0 = vpop.eup %3035  ;;  %v1628_v1 = vpack.c.bf16 %v3034_v63, %v3032_v61 }
 0x92d   : > { %v3038_v2 = vpop.eup %3037 }
 0x92e   : > { %2787 = vmatpush3.bf16.msra.mxu1 %v1628_v1  ;;  %2798 = vmatprep.subr.bf16.mxu0 %v1628_v1  ;;  %v1627_v3 = vpack.c.bf16 %v3038_v2, %v3036_v0 }
 0x92f   : > { %2799 = vmatpush3.bf16.msra.mxu0 %v1628_v1  ;;  %2788 = vmatprep.subr.bf16.mxu1 %v3118_v7 }
 0x930   : > { %2800 = vmatprep.subr.bf16.mxu0 %v1627_v3 }
 0x932   : > { %2789 = vmatpush3.bf16.msra.mxu1 %v1627_v3 }
 0x933   : > { %2801 = vmatpush3.bf16.msra.mxu0 %v1627_v3  ;;  %2790 = vmatprep.subr.bf16.mxu1 %v3118_v7 }
 0x934   : > { %2802 = vmatprep.subr.bf16.mxu0 %v1573_v46 }
 0x936   : > { %2791 = vmatpush3.bf16.msra.mxu1 %v1573_v46 }
 0x937   : > { %2803 = vmatpush3.bf16.msra.mxu0 %v1573_v46  ;;  %2792 = vmatprep.subr.bf16.mxu1 %v3118_v7 }
 0x938   : > { %2804 = vmatprep.subr.bf16.mxu0 %v1572_v49 }
 0x93a   : > { %2793 = vmatpush3.bf16.msra.mxu1 %v1572_v49 }
 0x93b   : > { %2805 = vmatpush3.bf16.msra.mxu0 %v1572_v49  ;;  %2917 = vmatprep.subr.msk.bf16.mxu1 %vm677_vm1, %v2438_v4 }
 0x93d   : > { %2795 = vmatmul.mubr.msk.bf16.vlgmr.msra.gmra.mxu1 %vm604_vm0, %v3330_v31 }
 0x93e   : > { %2811 = vmatpush3.bf16.msra.mxu1 %v1722_v5  ;;  %2807 = vmatmul.mubr.msk.bf16.vlgmr.msra.gmra.mxu0 %vm604_vm0, %v3235_v22 }
 0x93f   : > { %2812 = vmatprep.mubr.msk.bf16.mxu1 %vm670_vm2, %v3240_v23  ;;  %2820 = vmatprep.mubr.msk.bf16.mxu0 %vm746_vm3, %v3260_v26 }
 0x940   : > { %2824 = vmatprep.subr.bf16.mxu1 %v3118_v7 }
 0x945   : > { %2813 = vmatmul.mubr.msk.bf16.vlgmr.msra.gmra.mxu1 %vm670_vm2, %v3251_v25 }
 0x946   : > { %2832 = vmatprep.mubr.msk.bf16.mxu1 %vm3119_vm4, %v3118_v7 }
 0x9fd   : > { %v1663_v6 = vpop.f32.mrf.mxu1 }
 0x9fe   : > { %v3456_v8 = vadd.f32 %v1663_v6, %v3426_v24  ;;  %v2808_v10 = vpop.f32.mrf.mxu0 }
 0x9ff   : > { %v2796_v9 = vpop.f32.mrf.mxu1 }
 0xa00   : > { %v1706_v12 = vpop.f32.mrf.mxu0 }
 0xa01   : > { %v1666_v11 = vpop.f32.mrf.mxu1 }
 0xa02   : > { %v2809_v15 = vpop.f32.mrf.mxu0 }
 0xa03   : > { %v2797_v13 = vpop.f32.mrf.mxu1 }
 0xa04   : > { %v1709_v27 = vpop.f32.mrf.mxu0 }
 0xa05   : > { %v2814_v14 = vpop.f32.mrf.mxu1 }
 0xa06   : > { %v1767_v17 = vadd.f32 %v2814_v14, %v2808_v10 }
 0xa07   : > { %v1758_v18 = vpop.f32.mrf.mxu1 }
 0xa08   : > { %v1759_v19 = vadd.f32 %v1758_v18, %v1706_v12  ;;  %3039 = vtanh.f32 %v1767_v17  ;;  %v3087_v12 = vld [vmem:[%s3560_s4] sm:$0xff]  }
 0xa09   : > { %v2815_v20 = vpop.f32.mrf.mxu1 }
 0xa0a   : > { %v1770_v21 = vadd.f32 %v2815_v20, %v2809_v15 }
 0xa0b   : > { %v1761_v28 = vpop.f32.mrf.mxu1 }
 0xa0c   : > { %3041 = vtanh.f32 %v1770_v21  ;;  %v1762_v29 = vadd.f32 %v1761_v28, %v1709_v27 }
 0xa0d   : > { %3043 = vtanh.f32 %v1759_v19 }
 0xa0e   : > { %3045 = vtanh.f32 %v1762_v29 }
 0xa15   : > { %v3040_v24 = vpop.eup %3039 }
 0xa19   : > { %v3042_v30 = vpop.eup %3041 }
 0xa1a   : > { %v3044_v32 = vpop.eup %3043  ;;  %v1778_v33 = vpack.c.bf16 %v3042_v30, %v3040_v24 }
 0xa1b   : > { %v3046_v34 = vpop.eup %3045 }
 0xa1c   : > { %2816 = vmatprep.subr.bf16.mxu0 %v1778_v33  ;;  %v1777_v35 = vpack.c.bf16 %v3046_v34, %v3044_v32  ;;  %v2454_v32 = vld [vmem:[%s3229_s27 + $0x1c] sm:$0xf]  ;;  %v3088_v34 = vld [vmem:[%s3560_s4 + $0x8] sm:$0xff]  }
 0xa1d   : > { %2817 = vmatpush3.bf16.msra.mxu0 %v1778_v33 }
 0xa1e   : > { %2818 = vmatprep.subr.bf16.mxu0 %v1777_v35 }
 0xa21   : > { %2819 = vmatpush3.bf16.msra.mxu0 %v1777_v35 }
 0xa24   : > { %2821 = vmatmul.mubr.msk.bf16.vlgmr.msra.gmra.mxu0 %vm746_vm3, %v3286_v50 }
 0xa25   : > { %2844 = vmatprep.mubr.msk.bf16.mxu0 %vm604_vm0, %v3225_v16 }
 0xae4   : > { %v2822_v36 = vpop.f32.mrf.mxu0 }
 0xae5   : > { %v1822_v37 = vadd.f32 %v2822_v36, %v3300_v53  ;;  %v3090_v36 = vld [vmem:[%s3561_s5] sm:$0xff]  }
 0xae6   : > { %v1813_v38 = vpop.f32.mrf.mxu0 }
 0xae7   : > { %v1814_v39 = vadd.f32 %v1813_v38, %v3302_v54  ;;  %3047 = vtanh.f32 %v1822_v37  ;;  %v3091_v37 = vld [vmem:[%s3559_s3 + $0x8] sm:$0xff]  }
 0xae8   : > { %v2823_v41 = vpop.f32.mrf.mxu0 }
 0xae9   : > { %v1825_v42 = vadd.f32 %v2823_v41, %v3305_v58 }
 0xaea   : > { %v1816_v43 = vpop.f32.mrf.mxu0 }
 0xaeb   : > { %3049 = vtanh.f32 %v1825_v42  ;;  %v1817_v40 = vadd.f32 %v1816_v43, %v3309_v62 }
 0xaec   : > { %3051 = vtanh.f32 %v1814_v39 }
 0xaed   : > { %3053 = vtanh.f32 %v1817_v40 }
 0xaf4   : > { %v3048_v44 = vpop.eup %3047 }
 0xaf8   : > { %v3050_v45 = vpop.eup %3049 }
 0xaf9   : > { %v3052_v46 = vpop.eup %3051  ;;  %v1833_v16 = vpack.c.bf16 %v3050_v45, %v3048_v44 }
 0xafa   : > { %v3054_v47 = vpop.eup %3053 }
 0xafb   : > { %2825 = vmatpush3.bf16.msra.mxu1 %v1833_v16  ;;  %2836 = vmatprep.subr.bf16.mxu0 %v1833_v16  ;;  %v1832_v49 = vpack.c.bf16 %v3054_v47, %v3052_v46 }
 0xafc   : > { %2837 = vmatpush3.bf16.msra.mxu0 %v1833_v16  ;;  %2826 = vmatprep.subr.bf16.mxu1 %v3118_v7 }
 0xafd   : > { %2838 = vmatprep.subr.bf16.mxu0 %v1832_v49 }
 0xaff   : > { %2827 = vmatpush3.bf16.msra.mxu1 %v1832_v49 }
 0xb00   : > { %2839 = vmatpush3.bf16.msra.mxu0 %v1832_v49  ;;  %2828 = vmatprep.subr.bf16.mxu1 %v3118_v7 }
 0xb01   : > { %2840 = vmatprep.subr.bf16.mxu0 %v1778_v33 }
 0xb03   : > { %2829 = vmatpush3.bf16.msra.mxu1 %v1778_v33 }
 0xb04   : > { %2841 = vmatpush3.bf16.msra.mxu0 %v1778_v33  ;;  %2830 = vmatprep.subr.bf16.mxu1 %v3118_v7  ;;  %v2132_v33 = vsel %vm677_vm1, %v2454_v32, 0 }
 0xb05   : > { %2842 = vmatprep.subr.bf16.mxu0 %v1777_v35 }
 0xb07   : > { %2831 = vmatpush3.bf16.msra.mxu1 %v1777_v35 }
 0xb08   : > { %2843 = vmatpush3.bf16.msra.mxu0 %v1777_v35  ;;  %2918 = vmatprep.subr.msk.bf16.mxu1 %vm677_vm1, %v2446_v51  ;;  %v3089_v35 = vld [vmem:[%s3559_s3] sm:$0xff]  }
 0xb0a   : > { %2833 = vmatmul.mubr.msk.bf16.vlgmr.msra.gmra.mxu1 %vm604_vm0, %v3330_v31 }
 0xb0b   : > { %2849 = vmatpush3.bf16.msra.mxu1 %v1927_v52  ;;  %2845 = vmatmul.mubr.msk.bf16.vlgmr.msra.gmra.mxu0 %vm604_vm0, %v3235_v22 }
 0xb0c   : > { %2850 = vmatprep.mubr.msk.bf16.mxu1 %vm670_vm2, %v3240_v23  ;;  %2858 = vmatprep.mubr.msk.bf16.mxu0 %vm746_vm3, %v3260_v26 }
 0xb0d   : > { %2862 = vmatprep.subr.bf16.mxu1 %v3118_v7 }
 0xb12   : > { %2851 = vmatmul.mubr.msk.bf16.vlgmr.msra.gmra.mxu1 %vm670_vm2, %v3251_v25 }
 0xb13   : > { %2870 = vmatprep.mubr.msk.bf16.mxu1 %vm3119_vm4, %v3118_v7 }
 0xbca   : > { %v1868_v56 = vpop.f32.mrf.mxu1 }
 0xbcb   : > { %v3486_v57 = vadd.f32 %v1868_v56, %v3456_v8  ;;  %v2846_v22 = vpop.f32.mrf.mxu0 }
 0xbcc   : > { %v2834_v59 = vpop.f32.mrf.mxu1 }
 0xbcd   : > { %v1911_v48 = vpop.f32.mrf.mxu0 }
 0xbce   : > { %v1871_v60 = vpop.f32.mrf.mxu1 }
 0xbcf   : > { %v2847_v61 = vpop.f32.mrf.mxu0 }
 0xbd0   : > { %v2835_v23 = vpop.f32.mrf.mxu1 }
 0xbd1   : > { %v1914_v25 = vpop.f32.mrf.mxu0 }
 0xbd2   : > { %v2852_v55 = vpop.f32.mrf.mxu1 }
 0xbd3   : > { %v1972_v26 = vadd.f32 %v2852_v55, %v2846_v22 }
 0xbd4   : > { %v1963_v63 = vpop.f32.mrf.mxu1 }
 0xbd5   : > { %v1964_v0 = vadd.f32 %v1963_v63, %v1911_v48  ;;  %3055 = vtanh.f32 %v1972_v26  ;;  %v3092_v26 = vld [vmem:[%s3561_s5 + $0x8] sm:$0xff]  }
 0xbd6   : > { %v2853_v1 = vpop.f32.mrf.mxu1 }
 0xbd7   : > { %v1975_v2 = vadd.f32 %v2853_v1, %v2847_v61 }
 0xbd8   : > { %v1966_v3 = vpop.f32.mrf.mxu1 }
 0xbd9   : > { %3057 = vtanh.f32 %v1975_v2  ;;  %v1967_v4 = vadd.f32 %v1966_v3, %v1914_v25 }
 0xbda   : > { %3059 = vtanh.f32 %v1964_v0 }
 0xbdb   : > { %3061 = vtanh.f32 %v1967_v4 }
 0xbe2   : > { %v3056_v5 = vpop.eup %3055 }
 0xbe6   : > { %v3058_v6 = vpop.eup %3057 }
 0xbe7   : > { %v3060_v8 = vpop.eup %3059  ;;  %v1983_v9 = vpack.c.bf16 %v3058_v6, %v3056_v5 }
 0xbe8   : > { %v3062_v10 = vpop.eup %3061 }
 0xbe9   : > { %2854 = vmatprep.subr.bf16.mxu0 %v1983_v9  ;;  %v1982_v11 = vpack.c.bf16 %v3062_v10, %v3060_v8 }
 0xbea   : > { %2855 = vmatpush3.bf16.msra.mxu0 %v1983_v9 }
 0xbeb   : > { %2856 = vmatprep.subr.bf16.mxu0 %v1982_v11 }
 0xbee   : > { %2857 = vmatpush3.bf16.msra.mxu0 %v1982_v11 }
 0xbf1   : > { %2859 = vmatmul.mubr.msk.bf16.vlgmr.msra.gmra.mxu0 %vm746_vm3, %v3286_v50 }
 0xbf2   : > { %2882 = vmatprep.mubr.msk.bf16.mxu0 %vm604_vm0, %v3087_v12 }
 0xcb1   : > { %v2860_v13 = vpop.f32.mrf.mxu0 }
 0xcb2   : > { %v2027_v14 = vadd.f32 %v2860_v13, %v3300_v53 }
 0xcb3   : > { %v2018_v15 = vpop.f32.mrf.mxu0 }
 0xcb4   : > { %v2019_v17 = vadd.f32 %v2018_v15, %v3302_v54  ;;  %3063 = vtanh.f32 %v2027_v14 }
 0xcb5   : > { %v2861_v18 = vpop.f32.mrf.mxu0 }
 0xcb6   : > { %v2030_v19 = vadd.f32 %v2861_v18, %v3305_v58 }
 0xcb7   : > { %v2021_v20 = vpop.f32.mrf.mxu0 }
 0xcb8   : > { %3065 = vtanh.f32 %v2030_v19  ;;  %v2022_v50 = vadd.f32 %v2021_v20, %v3309_v62 }
 0xcb9   : > { %3067 = vtanh.f32 %v2019_v17 }
 0xcba   : > { %3069 = vtanh.f32 %v2022_v50 }
 0xcc1   : > { %v3064_v21 = vpop.eup %3063 }
 0xcc5   : > { %v3066_v27 = vpop.eup %3065 }
 0xcc6   : > { %v3068_v28 = vpop.eup %3067  ;;  %v2038_v29 = vpack.c.bf16 %v3066_v27, %v3064_v21 }
 0xcc7   : > { %v3070_v24 = vpop.eup %3069 }
 0xcc8   : > { %2863 = vmatpush3.bf16.msra.mxu1 %v2038_v29  ;;  %2874 = vmatprep.subr.bf16.mxu0 %v2038_v29  ;;  %v2037_v30 = vpack.c.bf16 %v3070_v24, %v3068_v28 }
 0xcc9   : > { %2875 = vmatpush3.bf16.msra.mxu0 %v2038_v29  ;;  %2864 = vmatprep.subr.bf16.mxu1 %v3118_v7 }
 0xcca   : > { %2876 = vmatprep.subr.bf16.mxu0 %v2037_v30 }
 0xccc   : > { %2865 = vmatpush3.bf16.msra.mxu1 %v2037_v30 }
 0xccd   : > { %2877 = vmatpush3.bf16.msra.mxu0 %v2037_v30  ;;  %2866 = vmatprep.subr.bf16.mxu1 %v3118_v7 }
 0xcce   : > { %2878 = vmatprep.subr.bf16.mxu0 %v1983_v9 }
 0xcd0   : > { %2867 = vmatpush3.bf16.msra.mxu1 %v1983_v9 }
 0xcd1   : > { %2879 = vmatpush3.bf16.msra.mxu0 %v1983_v9  ;;  %2868 = vmatprep.subr.bf16.mxu1 %v3118_v7 }
 0xcd2   : > { %2880 = vmatprep.subr.bf16.mxu0 %v1982_v11 }
 0xcd4   : > { %2869 = vmatpush3.bf16.msra.mxu1 %v1982_v11 }
 0xcd5   : > { %2881 = vmatpush3.bf16.msra.mxu0 %v1982_v11  ;;  %2919 = vmatprep.subr.msk.bf16.mxu1 %vm677_vm1, %v2454_v32 }
 0xcd7   : > { %2871 = vmatmul.mubr.msk.bf16.vlgmr.msra.gmra.mxu1 %vm604_vm0, %v3330_v31 }
 0xcd8   : > { %2887 = vmatpush3.bf16.msra.mxu1 %v2132_v33  ;;  %2883 = vmatmul.mubr.msk.bf16.vlgmr.msra.gmra.mxu0 %vm604_vm0, %v3088_v34 }
 0xcd9   : > { %2888 = vmatprep.mubr.msk.bf16.mxu1 %vm670_vm2, %v3089_v35  ;;  %2896 = vmatprep.mubr.msk.bf16.mxu0 %vm746_vm3, %v3090_v36 }
 0xcda   : > { %2900 = vmatprep.subr.bf16.mxu1 %v3118_v7 }
 0xcdf   : > { %2889 = vmatmul.mubr.msk.bf16.vlgmr.msra.gmra.mxu1 %vm670_vm2, %v3091_v37 }
 0xce0   : > { %2908 = vmatprep.mubr.msk.bf16.mxu1 %vm3119_vm4, %v3118_v7 }
 0xd97   : > { %v2073_v38 = vpop.f32.mrf.mxu1 }
 0xd98   : > { %v2079_v39 = vadd.f32 %v2073_v38, %v3486_v57  ;;  %v2884_v42 = vpop.f32.mrf.mxu0 }
 0xd99   : > { %v2872_v41 = vpop.f32.mrf.mxu1 }
 0xd9a   : > { %v2116_v40 = vpop.f32.mrf.mxu0 }
 0xd9b   : > { %v2076_v43 = vpop.f32.mrf.mxu1 }
 0xd9c   : > { %v2885_v46 = vpop.f32.mrf.mxu0 }
 0xd9d   : > { %v2873_v44 = vpop.f32.mrf.mxu1 }
 0xd9e   : > { %v2119_v56 = vpop.f32.mrf.mxu0 }
 0xd9f   : > { %v2890_v45 = vpop.f32.mrf.mxu1 }
 0xda0   : > { %v2177_v16 = vadd.f32 %v2890_v45, %v2884_v42 }
 0xda1   : > { %v2168_v47 = vpop.f32.mrf.mxu1 }
 0xda2   : > { %v2169_v49 = vadd.f32 %v2168_v47, %v2116_v40  ;;  %3071 = vtanh.f32 %v2177_v16 }
 0xda3   : > { %v2891_v51 = vpop.f32.mrf.mxu1 }
 0xda4   : > { %v2180_v52 = vadd.f32 %v2891_v51, %v2885_v46 }
 0xda5   : > { %v2171_v59 = vpop.f32.mrf.mxu1 }
 0xda6   : > { %3073 = vtanh.f32 %v2180_v52  ;;  %v2172_v22 = vadd.f32 %v2171_v59, %v2119_v56 }
 0xda7   : > { %3075 = vtanh.f32 %v2169_v49 }
 0xda8   : > { %3077 = vtanh.f32 %v2172_v22 }
 0xdaf   : > { %v3072_v57 = vpop.eup %3071 }
 0xdb3   : > { %v3074_v60 = vpop.eup %3073 }
 0xdb4   : > { %v3076_v48 = vpop.eup %3075  ;;  %v2188_v23 = vpack.c.bf16 %v3074_v60, %v3072_v57 }
 0xdb5   : > { %v3078_v55 = vpop.eup %3077 }
 0xdb6   : > { %2892 = vmatprep.subr.bf16.mxu0 %v2188_v23  ;;  %v2187_v61 = vpack.c.bf16 %v3078_v55, %v3076_v48 }
 0xdb7   : > { %2893 = vmatpush3.bf16.msra.mxu0 %v2188_v23 }
 0xdb8   : > { %2894 = vmatprep.subr.bf16.mxu0 %v2187_v61 }
 0xdbb   : > { %2895 = vmatpush3.bf16.msra.mxu0 %v2187_v61 }
 0xdbe   : > { %2897 = vmatmul.mubr.msk.bf16.vlgmr.msra.gmra.mxu0 %vm746_vm3, %v3092_v26 }
 0xe7e   : > { %v2898_v63 = vpop.f32.mrf.mxu0 }
 0xe7f   : > { %v2232_v0 = vadd.f32 %v2898_v63, %v3300_v53 }
 0xe80   : > { %v2223_v1 = vpop.f32.mrf.mxu0 }
 0xe81   : > { %3079 = vtanh.f32 %v2232_v0  ;;  %v2224_v4 = vadd.f32 %v2223_v1, %v3302_v54 }
 0xe82   : > { %v2899_v2 = vpop.f32.mrf.mxu0 }
 0xe83   : > { %v2235_v25 = vadd.f32 %v2899_v2, %v3305_v58 }
 0xe84   : > { %v2226_v3 = vpop.f32.mrf.mxu0 }
 0xe85   : > { %3081 = vtanh.f32 %v2235_v25  ;;  %v2227_v5 = vadd.f32 %v2226_v3, %v3309_v62 }
 0xe87   : > { %3083 = vtanh.f32 %v2227_v5 }
 0xe88   : > { %3085 = vtanh.f32 %v2224_v4 }
 0xe8e   : > { %v3080_v6 = vpop.eup %3079 }
 0xe92   : > { %v3082_v8 = vpop.eup %3081 }
 0xe93   : > { %v2243_v9 = vpack.c.bf16 %v3082_v8, %v3080_v6 }
 0xe94   : > { %v3084_v10 = vpop.eup %3083 }
 0xe95   : > { %2901 = vmatpush3.bf16.msra.mxu1 %v2243_v9  ;;  %v3086_v53 = vpop.eup %3085 }
 0xe96   : > { %2902 = vmatprep.subr.bf16.mxu1 %v3118_v7  ;;  %v2242_v58 = vpack.c.bf16 %v3084_v10, %v3086_v53 }
 0xe99   : > { %2903 = vmatpush3.bf16.msra.mxu1 %v2242_v58 }
 0xe9a   : > { %2904 = vmatprep.subr.bf16.mxu1 %v3118_v7 }
 0xe9d   : > { %2905 = vmatpush3.bf16.msra.mxu1 %v2188_v23 }
 0xe9e   : > { %2906 = vmatprep.subr.bf16.mxu1 %v3118_v7 }
 0xea1   : > { %2907 = vmatpush3.bf16.msra.mxu1 %v2187_v61 }
 0xea4   : > { %2909 = vmatmul.mubr.msk.bf16.vlgmr.msra.gmra.mxu1 %vm604_vm0, %v3330_v31 }
 0xf64   : > { %v2278_v54 = vpop.f32.mrf.mxu1 }
 0xf65   : > { %v2284_v62 = vadd.f32 %v2278_v54, %v2079_v39 }
 0xf66   : > { %v2910_v11 = vpop.f32.mrf.mxu1 }
 0xf67   : > { %2285 = vst [vmem:[%s522_s10] sm:$0x1] %v2284_v62 }
 0xf68   : > { %v2281_v12 = vpop.f32.mrf.mxu1 }
 0xf6a   : > { %v2911_v13 = vpop.f32.mrf.mxu1 }
 0xf6b PF: > { %p15_p9 = scmp.ge.s32.totalorder %s3182_s9, 4   ;;  %s3566_s27 = smov %s3111_s28 }
 0xf6c   : > { %s3567_s28 = smov %s3191_s12  ;;  %s3568_s29 = smov %s3182_s9 }
 0xf6d   :  { %17 = sbr.rel (!%p15_p9) target bundleno = 2 (0x2), region = 233 }

</bundles_post_ra>
